<compile_context>
chip_gen: v6e
topology: v6e:2x2x1
jax: 0.10.0
libtpu: 0.0.40
codegen_flags: <defaults>
</compile_context>

<pallas_src>
import functools

import jax
import jax.numpy as jnp
from jax.experimental import pallas as pl
from jax.experimental.pallas import tpu as pltpu


# ----------------------------- model hyper-params ---------------------------
BATCH = 2
SEQ_LEN = 8
INPUT_DIM = 16
MODEL_DIM = 32
NUM_HEADS = 4
HEAD_DIM = MODEL_DIM // NUM_HEADS
P_ENC_DIM = 16          # "model_dim" of the PositionalEncoding sub-module
DIM_FF = 32             # dim_feedforward of the outer module
LN_EPS = 1e-5

PACK_W = 128            # lane width of the packed parameter slab


def _round_up(n, m):
    return (n + m - 1) // m * m


# ------------------------------- Pallas kernel ------------------------------
def _mha_module_kernel(x_ref, p_ref, o_ref, *, off, B, S, H, HD, PED, DIN):
    def read(name):
        r0, nr, nc = off[name]           # static python ints -> static slices
        return p_ref[r0:r0 + nr, 0:nc]

    def layer_norm(t, w, b):
        # PyTorch nn.LayerNorm semantics: biased variance over the last dim.
        m = jnp.mean(t, axis=-1, keepdims=True)
        v = jnp.mean(jnp.square(t - m), axis=-1, keepdims=True)
        return (t - m) * jax.lax.rsqrt(v + LN_EPS) * w + b

    x = x_ref[...]                                        # (B*S, DIN) f32
    MD = H * HD

    # ---- fused input projection: one matmul -> [ qkv (3*MD) | pe1 (PED) | pad ] ----
    proj = jnp.dot(x, read("w_in"), preferred_element_type=jnp.float32) + read("b_in")

    # ---- PositionalEncoding branch, all heads at once (no per-head replication) ----
    pe1 = layer_norm(proj[:, 3 * MD:3 * MD + PED], read("pe_ln1_w"), read("pe_ln1_b"))
    pe2 = jnp.dot(pe1, read("wlin"), preferred_element_type=jnp.float32) + read("blin")
    # grouped (per-head) LayerNorm2 via a block-mean matmul (keeps everything 2-D)
    m_grp = read("m_grp")                                 # (H*PED, H*PED) block 1/PED
    mean = jnp.dot(pe2, m_grp, preferred_element_type=jnp.float32)
    cen = pe2 - mean
    var = jnp.dot(cen * cen, m_grp, preferred_element_type=jnp.float32)
    pe2n = cen * jax.lax.rsqrt(var + LN_EPS) * read("g2t") + read("b2t")
    # block-diagonal p_dec: every head decoded with ONE matmul -> (B*S, H*S)
    pdec = jnp.dot(pe2n, read("wdec_blk"), preferred_element_type=jnp.float32) + read("bdec_t")

    # ---- attention core: unrolled over (batch, head); pure 2-D MXU/VPU/EUP ops ----
    scale = 1.0 / jnp.sqrt(jnp.float32(HD))
    batch_rows = []
    for b in range(B):
        r0, r1 = b * S, (b + 1) * S
        ctx_h = []
        for h in range(H):
            base = 3 * HD * h                             # PyTorch qkv column layout
            qh = proj[r0:r1, base:base + HD]
            kh = proj[r0:r1, base + HD:base + 2 * HD]
            vh = proj[r0:r1, base + 2 * HD:base + 3 * HD]
            logits = jnp.dot(qh, kh.T, preferred_element_type=jnp.float32) * scale
            logits = logits + pdec[r0:r1, h * S:(h + 1) * S]
            logits = logits - jnp.max(logits, axis=-1, keepdims=True)
            e = jnp.exp(logits)
            probs = e * pl.reciprocal(jnp.sum(e, axis=-1, keepdims=True), approx=True)
            ctx_h.append(jnp.dot(probs, vh, preferred_element_type=jnp.float32))
        batch_rows.append(jnp.concatenate(ctx_h, axis=-1))   # (S, MD)
    ctx = jnp.concatenate(batch_rows, axis=0)                # (B*S, MD)

    attn = jnp.dot(ctx, read("wout"), preferred_element_type=jnp.float32) + read("bout")

    # ---- transformer-block epilogue: residual + LN + FFN + residual + LN ----
    x1 = layer_norm(attn + x, read("mod_ln1_w"), read("mod_ln1_b"))
    ff = jnp.maximum(
        jnp.dot(x1, read("w1"), preferred_element_type=jnp.float32) + read("b1"), 0.0)
    x2 = jnp.dot(ff, read("w2"), preferred_element_type=jnp.float32) + read("b2") + x1
    o_ref[...] = layer_norm(x2, read("mod_ln2_w"), read("mod_ln2_b")).astype(o_ref.dtype)


# --------------------------- parameter packing (wrapper) --------------------
def pack_params(p):
    H, HD, PED, S = NUM_HEADS, HEAD_DIM, P_ENC_DIM, SEQ_LEN

    # fused input projection weight/bias: x @ [Wqkv | Wpe1], padded to 128 lanes
    w_in = jnp.zeros((INPUT_DIM, PACK_W), jnp.float32)
    w_in = w_in.at[:, :3 * MODEL_DIM].set(p["wqkv"])
    w_in = w_in.at[:, 3 * MODEL_DIM:3 * MODEL_DIM + PED].set(p["wpe1"])
    b_in = jnp.zeros((1, PACK_W), jnp.float32)
    b_in = b_in.at[:, :3 * MODEL_DIM].set(p["bqkv"])
    b_in = b_in.at[:, 3 * MODEL_DIM:3 * MODEL_DIM + PED].set(p["bpe1"])

    eye_h = jnp.eye(H, dtype=jnp.float32)
    # block-mean matrix: (pe2 @ m_grp)[:, h*PED+c] = mean of head-h's PED columns
    m_grp = jnp.kron(eye_h, jnp.full((PED, PED), 1.0 / PED, jnp.float32))
    # LN2 affine tiled per head
    g2t = jnp.tile(p["pe_ln2_w"], (1, H))
    b2t = jnp.tile(p["pe_ln2_b"], (1, H))
    # block-diagonal decoder so all heads run in a single matmul
    wdec_blk = jnp.kron(eye_h, p["wdec"])                 # (H*PED, H*S)
    bdec_t = jnp.tile(p["bdec"], (1, H))                  # (1, H*S)

    entries = [
        ("w_in", w_in), ("b_in", b_in),
        ("pe_ln1_w", p["pe_ln1_w"]), ("pe_ln1_b", p["pe_ln1_b"]),
        ("wlin", p["wlin"]), ("blin", p["blin"]),
        ("m_grp", m_grp), ("g2t", g2t), ("b2t", b2t),
        ("wdec_blk", wdec_blk), ("bdec_t", bdec_t),
        ("wout", p["wout"]), ("bout", p["bout"]),
        ("mod_ln1_w", p["mod_ln1_w"]), ("mod_ln1_b", p["mod_ln1_b"]),
        ("w1", p["w1"]), ("b1", p["b1"]),
        ("w2", p["w2"]), ("b2", p["b2"]),
        ("mod_ln2_w", p["mod_ln2_w"]), ("mod_ln2_b", p["mod_ln2_b"]),
    ]
    offsets, blocks, r = {}, [], 0
    for name, a in entries:
        a = jnp.asarray(a, jnp.float32)
        nr, nc = a.shape
        nr_pad = _round_up(nr, 8)                         # sublane-aligned starts
        blk = jnp.zeros((nr_pad, PACK_W), jnp.float32).at[:nr, :nc].set(a)
        offsets[name] = (r, nr, nc)
        blocks.append(blk)
        r += nr_pad
    slab = jnp.concatenate(blocks, axis=0)                # (~352, 128) f32, ~176 KiB
    return slab, offsets


# --------------------------------- wrapper -----------------------------------
def mha_module_forward(x, params):
    B, S, Din = x.shape
    slab, off = pack_params(params)
    n_rows = slab.shape[0]
    x_flat = x.reshape(B * S, Din)

    kernel = functools.partial(
        _mha_module_kernel, off=off,
        B=B, S=S, H=NUM_HEADS, HD=HEAD_DIM, PED=P_ENC_DIM, DIN=Din)

    out = pl.pallas_call(
        kernel,
        out_shape=jax.ShapeDtypeStruct((B * S, Din), x.dtype),
        grid=(1,),                                        # whole problem in one step
        in_specs=[
            pl.BlockSpec((B * S, Din), lambda i: (0, 0)),
            pl.BlockSpec((n_rows, PACK_W), lambda i: (0, 0)),
        ],
        out_specs=pl.BlockSpec((B * S, Din), lambda i: (0, 0)),
        compiler_params=pltpu.CompilerParams(dimension_semantics=("arbitrary",)),
    )(x_flat, slab)
    return out.reshape(B, S, Din)


# ------------------------- pure-JAX reference (for check) -------------------
def _ln_ref(t, w, b):
    m = jnp.mean(t, axis=-1, keepdims=True)
    v = jnp.mean(jnp.square(t - m), axis=-1, keepdims=True)
    return (t - m) * jax.lax.rsqrt(v + LN_EPS) * w + b


def reference(x, p):
    B, S, _ = x.shape
    qkv = x @ p["wqkv"] + p["bqkv"]
    qkv = qkv.reshape(B, S, NUM_HEADS, 3 * HEAD_DIM).transpose(0, 2, 1, 3)
    q, k, v = jnp.split(qkv, 3, axis=-1)
    att = jnp.einsum("bhqd,bhkd->bhqk", q, k) / jnp.sqrt(jnp.float32(HEAD_DIM))

    pe = _ln_ref(x @ p["wpe1"] + p["bpe1"], p["pe_ln1_w"], p["pe_ln1_b"])
    pe = pe @ p["wlin"] + p["blin"]
    pe = pe.reshape(B, S, NUM_HEADS, P_ENC_DIM).transpose(0, 2, 1, 3)
    pe = _ln_ref(pe, p["pe_ln2_w"], p["pe_ln2_b"])
    pe = pe @ p["wdec"] + p["bdec"]                       # (B, H, S, S)

    att = jax.nn.softmax(att + pe, axis=-1)
    out = jnp.einsum("bhqk,bhkd->bhqd", att, v)
    out = out.transpose(0, 2, 1, 3).reshape(B, S, MODEL_DIM)
    attn = out @ p["wout"] + p["bout"]

    x1 = _ln_ref(attn + x, p["mod_ln1_w"], p["mod_ln1_b"])
    ff = jax.nn.relu(x1 @ p["w1"] + p["b1"])
    x2 = ff @ p["w2"] + p["b2"] + x1
    return _ln_ref(x2, p["mod_ln2_w"], p["mod_ln2_b"])


# ----------------------------- parameter setup ------------------------------
def init_params(key):
    ks = jax.random.split(key, 7)

    def lin(k, fan_in, fan_out):
        w = 0.05 * jax.random.normal(k, (fan_in, fan_out), jnp.float32)
        b = 0.01 * jnp.arange(fan_out, dtype=jnp.float32).reshape(1, fan_out)
        return w, b

    def ln(dim):
        w = 1.0 + 0.02 * jnp.arange(dim, dtype=jnp.float32).reshape(1, dim)
        b = 0.01 * jnp.arange(dim, dtype=jnp.float32).reshape(1, dim) - 0.05
        return w, b

    p = {}
    p["wqkv"], p["bqkv"] = lin(ks[0], INPUT_DIM, 3 * MODEL_DIM)
    p["wout"], p["bout"] = lin(ks[1], MODEL_DIM, INPUT_DIM)
    p["wpe1"], p["bpe1"] = lin(ks[2], INPUT_DIM, P_ENC_DIM)
    p["wlin"], p["blin"] = lin(ks[3], P_ENC_DIM, NUM_HEADS * P_ENC_DIM)
    p["wdec"], p["bdec"] = lin(ks[4], P_ENC_DIM, SEQ_LEN)
    p["w1"], p["b1"] = lin(ks[5], INPUT_DIM, DIM_FF)
    p["w2"], p["b2"] = lin(ks[6], DIM_FF, INPUT_DIM)
    p["pe_ln1_w"], p["pe_ln1_b"] = ln(P_ENC_DIM)
    p["pe_ln2_w"], p["pe_ln2_b"] = ln(P_ENC_DIM)
    p["mod_ln1_w"], p["mod_ln1_b"] = ln(INPUT_DIM)
    p["mod_ln2_w"], p["mod_ln2_b"] = ln(INPUT_DIM)
    return p


if __name__ == "__main__":
    key = jax.random.PRNGKey(0)
    kx, kp = jax.random.split(key)
    x = jax.random.normal(kx, (BATCH, SEQ_LEN, INPUT_DIM), jnp.float32)
    params = init_params(kp)

    out = mha_module_forward(x, params)
    out = jax.block_until_ready(out)

    ref = reference(x, params)
    assert out.shape == (BATCH, SEQ_LEN, INPUT_DIM)
    err = float(jnp.max(jnp.abs(out - ref)))
    # tolerance loosened slightly vs 1e-4 because the softmax denominator now uses the
    # approximate EUP reciprocal (pl.reciprocal(..., approx=True)).
    assert jnp.allclose(out, ref, atol=5e-3, rtol=5e-3), err
    print("KERNEL_OK")
</pallas_src>

<mosaic_0001>
module attributes {stable_mosaic.version = 11 : i64} {
  func.func @_mha_module_kernel(%arg0: i32, %arg1: memref<16x16xf32, #tpu.memory_space<vmem>>, %arg2: memref<352x128xf32, #tpu.memory_space<vmem>>, %arg3: memref<16x16xf32, #tpu.memory_space<vmem>>) attributes {dimension_semantics = [#tpu.dimension_semantics<arbitrary>], iteration_bounds = array<i64: 1>, scalar_prefetch = 0 : i64, scratch_operands = 0 : i64, tpu.core_type = #tpu.core_type<tc>, window_params = [{pipeline_mode = #tpu.pipeline_mode<synchronous>, transform_indices = @transform_0, window_bounds = array<i64: 16, 16>}, {pipeline_mode = #tpu.pipeline_mode<synchronous>, transform_indices = @transform_1, window_bounds = array<i64: 352, 128>}, {pipeline_mode = #tpu.pipeline_mode<synchronous>, transform_indices = @transform_2, window_bounds = array<i64: 16, 16>}]} {
    %c0 = arith.constant 0 : index
    %c0_0 = arith.constant 0 : index
    %0 = vector.load %arg1[%c0, %c0_0] : memref<16x16xf32, #tpu.memory_space<vmem>>, vector<16x16xf32>
    %c0_1 = arith.constant 0 : index
    %c0_2 = arith.constant 0 : index
    %1 = vector.load %arg2[%c0_1, %c0_2] : memref<352x128xf32, #tpu.memory_space<vmem>>, vector<16x128xf32>
    %cst = arith.constant dense<0.000000e+00> : vector<16x128xf32>
    %2 = tpu.matmul %0, %1, %cst {dimension_numbers = #tpu.dot_dimension_numbers<[1], [0], [0], [1], [0, 0, 1, 1], [], []>} : vector<16x16xf32>, vector<16x128xf32>, vector<16x128xf32> -> vector<16x128xf32>
    %c16 = arith.constant 16 : index
    %c0_3 = arith.constant 0 : index
    %3 = vector.load %arg2[%c16, %c0_3] : memref<352x128xf32, #tpu.memory_space<vmem>>, vector<1x128xf32>
    %4 = vector.broadcast %3 : vector<1x128xf32> to vector<16x128xf32>
    %5 = arith.addf %2, %4 : vector<16x128xf32>
    %6 = vector.extract_strided_slice %5 {offsets = [0, 96], sizes = [16, 16], strides = [1, 1]} : vector<16x128xf32> to vector<16x16xf32>
    %c24 = arith.constant 24 : index
    %c0_4 = arith.constant 0 : index
    %7 = vector.load %arg2[%c24, %c0_4] : memref<352x128xf32, #tpu.memory_space<vmem>>, vector<1x16xf32>
    %c32 = arith.constant 32 : index
    %c0_5 = arith.constant 0 : index
    %8 = vector.load %arg2[%c32, %c0_5] : memref<352x128xf32, #tpu.memory_space<vmem>>, vector<1x16xf32>
    %cst_6 = arith.constant dense<0.000000e+00> : vector<16xf32>
    %9 = vector.multi_reduction <add>, %6, %cst_6 [1] : vector<16x16xf32> to vector<16xf32>
    %10 = vector.shape_cast %9 : vector<16xf32> to vector<16x1xf32>
    %cst_7 = arith.constant 1.600000e+01 : f32
    %11 = vector.broadcast %cst_7 : f32 to vector<16x1xf32>
    %12 = arith.divf %10, %11 : vector<16x1xf32>
    %13 = vector.broadcast %12 : vector<16x1xf32> to vector<16x16xf32>
    %14 = arith.subf %6, %13 : vector<16x16xf32>
    %15 = arith.mulf %14, %14 : vector<16x16xf32>
    %cst_8 = arith.constant dense<0.000000e+00> : vector<16xf32>
    %16 = vector.multi_reduction <add>, %15, %cst_8 [1] : vector<16x16xf32> to vector<16xf32>
    %17 = vector.shape_cast %16 : vector<16xf32> to vector<16x1xf32>
    %cst_9 = arith.constant 1.600000e+01 : f32
    %18 = vector.broadcast %cst_9 : f32 to vector<16x1xf32>
    %19 = arith.divf %17, %18 : vector<16x1xf32>
    %20 = vector.broadcast %12 : vector<16x1xf32> to vector<16x16xf32>
    %21 = arith.subf %6, %20 : vector<16x16xf32>
    %cst_10 = arith.constant 9.99999974E-6 : f32
    %22 = vector.broadcast %cst_10 : f32 to vector<16x1xf32>
    %23 = arith.addf %19, %22 : vector<16x1xf32>
    %24 = math.rsqrt %23 : vector<16x1xf32>
    %25 = vector.broadcast %24 : vector<16x1xf32> to vector<16x16xf32>
    %26 = arith.mulf %21, %25 : vector<16x16xf32>
    %27 = vector.broadcast %7 : vector<1x16xf32> to vector<16x16xf32>
    %28 = arith.mulf %26, %27 : vector<16x16xf32>
    %29 = vector.broadcast %8 : vector<1x16xf32> to vector<16x16xf32>
    %30 = arith.addf %28, %29 : vector<16x16xf32>
    %c40 = arith.constant 40 : index
    %c0_11 = arith.constant 0 : index
    %31 = vector.load %arg2[%c40, %c0_11] : memref<352x128xf32, #tpu.memory_space<vmem>>, vector<16x64xf32>
    %cst_12 = arith.constant dense<0.000000e+00> : vector<16x64xf32>
    %32 = tpu.matmul %30, %31, %cst_12 {dimension_numbers = #tpu.dot_dimension_numbers<[1], [0], [0], [1], [0, 0, 1, 1], [], []>} : vector<16x16xf32>, vector<16x64xf32>, vector<16x64xf32> -> vector<16x64xf32>
    %c56 = arith.constant 56 : index
    %c0_13 = arith.constant 0 : index
    %33 = vector.load %arg2[%c56, %c0_13] : memref<352x128xf32, #tpu.memory_space<vmem>>, vector<1x64xf32>
    %34 = vector.broadcast %33 : vector<1x64xf32> to vector<16x64xf32>
    %35 = arith.addf %32, %34 : vector<16x64xf32>
    %c64 = arith.constant 64 : index
    %c0_14 = arith.constant 0 : index
    %36 = vector.load %arg2[%c64, %c0_14] : memref<352x128xf32, #tpu.memory_space<vmem>>, vector<64x64xf32>
    %cst_15 = arith.constant dense<0.000000e+00> : vector<16x64xf32>
    %37 = tpu.matmul %35, %36, %cst_15 {dimension_numbers = #tpu.dot_dimension_numbers<[1], [0], [0], [1], [0, 0, 1, 1], [], []>} : vector<16x64xf32>, vector<64x64xf32>, vector<16x64xf32> -> vector<16x64xf32>
    %38 = arith.subf %35, %37 : vector<16x64xf32>
    %39 = arith.mulf %38, %38 : vector<16x64xf32>
    %cst_16 = arith.constant dense<0.000000e+00> : vector<16x64xf32>
    %40 = tpu.matmul %39, %36, %cst_16 {dimension_numbers = #tpu.dot_dimension_numbers<[1], [0], [0], [1], [0, 0, 1, 1], [], []>} : vector<16x64xf32>, vector<64x64xf32>, vector<16x64xf32> -> vector<16x64xf32>
    %cst_17 = arith.constant 9.99999974E-6 : f32
    %41 = vector.broadcast %cst_17 : f32 to vector<16x64xf32>
    %42 = arith.addf %40, %41 : vector<16x64xf32>
    %43 = math.rsqrt %42 : vector<16x64xf32>
    %44 = arith.mulf %38, %43 : vector<16x64xf32>
    %c128 = arith.constant 128 : index
    %c0_18 = arith.constant 0 : index
    %45 = vector.load %arg2[%c128, %c0_18] : memref<352x128xf32, #tpu.memory_space<vmem>>, vector<1x64xf32>
    %46 = vector.broadcast %45 : vector<1x64xf32> to vector<16x64xf32>
    %47 = arith.mulf %44, %46 : vector<16x64xf32>
    %c136 = arith.constant 136 : index
    %c0_19 = arith.constant 0 : index
    %48 = vector.load %arg2[%c136, %c0_19] : memref<352x128xf32, #tpu.memory_space<vmem>>, vector<1x64xf32>
    %49 = vector.broadcast %48 : vector<1x64xf32> to vector<16x64xf32>
    %50 = arith.addf %47, %49 : vector<16x64xf32>
    %c144 = arith.constant 144 : index
    %c0_20 = arith.constant 0 : index
    %51 = vector.load %arg2[%c144, %c0_20] : memref<352x128xf32, #tpu.memory_space<vmem>>, vector<64x32xf32>
    %cst_21 = arith.constant dense<0.000000e+00> : vector<16x32xf32>
    %52 = tpu.matmul %50, %51, %cst_21 {dimension_numbers = #tpu.dot_dimension_numbers<[1], [0], [0], [1], [0, 0, 1, 1], [], []>} : vector<16x64xf32>, vector<64x32xf32>, vector<16x32xf32> -> vector<16x32xf32>
    %c208 = arith.constant 208 : index
    %c0_22 = arith.constant 0 : index
    %53 = vector.load %arg2[%c208, %c0_22] : memref<352x128xf32, #tpu.memory_space<vmem>>, vector<1x32xf32>
    %54 = vector.broadcast %53 : vector<1x32xf32> to vector<16x32xf32>
    %55 = arith.addf %52, %54 : vector<16x32xf32>
    %cst_23 = arith.constant 8.000000e+00 : f32
    %56 = math.sqrt %cst_23 : f32
    %cst_24 = arith.constant 1.000000e+00 : f32
    %57 = arith.divf %cst_24, %56 : f32
    %58 = vector.extract_strided_slice %5 {offsets = [0, 0], sizes = [8, 8], strides = [1, 1]} : vector<16x128xf32> to vector<8x8xf32>
    %59 = vector.extract_strided_slice %5 {offsets = [0, 8], sizes = [8, 8], strides = [1, 1]} : vector<16x128xf32> to vector<8x8xf32>
    %60 = vector.extract_strided_slice %5 {offsets = [0, 16], sizes = [8, 8], strides = [1, 1]} : vector<16x128xf32> to vector<8x8xf32>
    %61 = tpu.transpose %59, [1, 0] : vector<8x8xf32> -> vector<8x8xf32>
    %cst_25 = arith.constant dense<0.000000e+00> : vector<8x8xf32>
    %62 = tpu.matmul %58, %61, %cst_25 {dimension_numbers = #tpu.dot_dimension_numbers<[1], [0], [0], [1], [0, 0, 1, 1], [], []>} : vector<8x8xf32>, vector<8x8xf32>, vector<8x8xf32> -> vector<8x8xf32>
    %63 = vector.broadcast %57 : f32 to vector<8x8xf32>
    %64 = arith.mulf %62, %63 : vector<8x8xf32>
    %65 = vector.extract_strided_slice %55 {offsets = [0, 0], sizes = [8, 8], strides = [1, 1]} : vector<16x32xf32> to vector<8x8xf32>
    %66 = arith.addf %64, %65 : vector<8x8xf32>
    %cst_26 = arith.constant dense<0xFF800000> : vector<8xf32>
    %67 = vector.multi_reduction <maximumf>, %66, %cst_26 [1] : vector<8x8xf32> to vector<8xf32>
    %68 = vector.shape_cast %67 : vector<8xf32> to vector<8x1xf32>
    %69 = vector.broadcast %68 : vector<8x1xf32> to vector<8x8xf32>
    %70 = arith.subf %66, %69 : vector<8x8xf32>
    %71 = math.exp %70 : vector<8x8xf32>
    %cst_27 = arith.constant dense<0.000000e+00> : vector<8xf32>
    %72 = vector.multi_reduction <add>, %71, %cst_27 [1] : vector<8x8xf32> to vector<8xf32>
    %73 = vector.shape_cast %72 : vector<8xf32> to vector<8x1xf32>
    %74 = tpu.reciprocal %73 {approx = true} : vector<8x1xf32> -> vector<8x1xf32>
    %75 = vector.broadcast %74 : vector<8x1xf32> to vector<8x8xf32>
    %76 = arith.mulf %71, %75 : vector<8x8xf32>
    %cst_28 = arith.constant dense<0.000000e+00> : vector<8x8xf32>
    %77 = tpu.matmul %76, %60, %cst_28 {dimension_numbers = #tpu.dot_dimension_numbers<[1], [0], [0], [1], [0, 0, 1, 1], [], []>} : vector<8x8xf32>, vector<8x8xf32>, vector<8x8xf32> -> vector<8x8xf32>
    %78 = vector.extract_strided_slice %5 {offsets = [0, 24], sizes = [8, 8], strides = [1, 1]} : vector<16x128xf32> to vector<8x8xf32>
    %79 = vector.extract_strided_slice %5 {offsets = [0, 32], sizes = [8, 8], strides = [1, 1]} : vector<16x128xf32> to vector<8x8xf32>
    %80 = vector.extract_strided_slice %5 {offsets = [0, 40], sizes = [8, 8], strides = [1, 1]} : vector<16x128xf32> to vector<8x8xf32>
    %81 = tpu.transpose %79, [1, 0] : vector<8x8xf32> -> vector<8x8xf32>
    %cst_29 = arith.constant dense<0.000000e+00> : vector<8x8xf32>
    %82 = tpu.matmul %78, %81, %cst_29 {dimension_numbers = #tpu.dot_dimension_numbers<[1], [0], [0], [1], [0, 0, 1, 1], [], []>} : vector<8x8xf32>, vector<8x8xf32>, vector<8x8xf32> -> vector<8x8xf32>
    %83 = vector.broadcast %57 : f32 to vector<8x8xf32>
    %84 = arith.mulf %82, %83 : vector<8x8xf32>
    %85 = vector.extract_strided_slice %55 {offsets = [0, 8], sizes = [8, 8], strides = [1, 1]} : vector<16x32xf32> to vector<8x8xf32>
    %86 = arith.addf %84, %85 : vector<8x8xf32>
    %cst_30 = arith.constant dense<0xFF800000> : vector<8xf32>
    %87 = vector.multi_reduction <maximumf>, %86, %cst_30 [1] : vector<8x8xf32> to vector<8xf32>
    %88 = vector.shape_cast %87 : vector<8xf32> to vector<8x1xf32>
    %89 = vector.broadcast %88 : vector<8x1xf32> to vector<8x8xf32>
    %90 = arith.subf %86, %89 : vector<8x8xf32>
    %91 = math.exp %90 : vector<8x8xf32>
    %cst_31 = arith.constant dense<0.000000e+00> : vector<8xf32>
    %92 = vector.multi_reduction <add>, %91, %cst_31 [1] : vector<8x8xf32> to vector<8xf32>
    %93 = vector.shape_cast %92 : vector<8xf32> to vector<8x1xf32>
    %94 = tpu.reciprocal %93 {approx = true} : vector<8x1xf32> -> vector<8x1xf32>
    %95 = vector.broadcast %94 : vector<8x1xf32> to vector<8x8xf32>
    %96 = arith.mulf %91, %95 : vector<8x8xf32>
    %cst_32 = arith.constant dense<0.000000e+00> : vector<8x8xf32>
    %97 = tpu.matmul %96, %80, %cst_32 {dimension_numbers = #tpu.dot_dimension_numbers<[1], [0], [0], [1], [0, 0, 1, 1], [], []>} : vector<8x8xf32>, vector<8x8xf32>, vector<8x8xf32> -> vector<8x8xf32>
    %98 = vector.extract_strided_slice %5 {offsets = [0, 48], sizes = [8, 8], strides = [1, 1]} : vector<16x128xf32> to vector<8x8xf32>
    %99 = vector.extract_strided_slice %5 {offsets = [0, 56], sizes = [8, 8], strides = [1, 1]} : vector<16x128xf32> to vector<8x8xf32>
    %100 = vector.extract_strided_slice %5 {offsets = [0, 64], sizes = [8, 8], strides = [1, 1]} : vector<16x128xf32> to vector<8x8xf32>
    %101 = tpu.transpose %99, [1, 0] : vector<8x8xf32> -> vector<8x8xf32>
    %cst_33 = arith.constant dense<0.000000e+00> : vector<8x8xf32>
    %102 = tpu.matmul %98, %101, %cst_33 {dimension_numbers = #tpu.dot_dimension_numbers<[1], [0], [0], [1], [0, 0, 1, 1], [], []>} : vector<8x8xf32>, vector<8x8xf32>, vector<8x8xf32> -> vector<8x8xf32>
    %103 = vector.broadcast %57 : f32 to vector<8x8xf32>
    %104 = arith.mulf %102, %103 : vector<8x8xf32>
    %105 = vector.extract_strided_slice %55 {offsets = [0, 16], sizes = [8, 8], strides = [1, 1]} : vector<16x32xf32> to vector<8x8xf32>
    %106 = arith.addf %104, %105 : vector<8x8xf32>
    %cst_34 = arith.constant dense<0xFF800000> : vector<8xf32>
    %107 = vector.multi_reduction <maximumf>, %106, %cst_34 [1] : vector<8x8xf32> to vector<8xf32>
    %108 = vector.shape_cast %107 : vector<8xf32> to vector<8x1xf32>
    %109 = vector.broadcast %108 : vector<8x1xf32> to vector<8x8xf32>
    %110 = arith.subf %106, %109 : vector<8x8xf32>
    %111 = math.exp %110 : vector<8x8xf32>
    %cst_35 = arith.constant dense<0.000000e+00> : vector<8xf32>
    %112 = vector.multi_reduction <add>, %111, %cst_35 [1] : vector<8x8xf32> to vector<8xf32>
    %113 = vector.shape_cast %112 : vector<8xf32> to vector<8x1xf32>
    %114 = tpu.reciprocal %113 {approx = true} : vector<8x1xf32> -> vector<8x1xf32>
    %115 = vector.broadcast %114 : vector<8x1xf32> to vector<8x8xf32>
    %116 = arith.mulf %111, %115 : vector<8x8xf32>
    %cst_36 = arith.constant dense<0.000000e+00> : vector<8x8xf32>
    %117 = tpu.matmul %116, %100, %cst_36 {dimension_numbers = #tpu.dot_dimension_numbers<[1], [0], [0], [1], [0, 0, 1, 1], [], []>} : vector<8x8xf32>, vector<8x8xf32>, vector<8x8xf32> -> vector<8x8xf32>
    %118 = vector.extract_strided_slice %5 {offsets = [0, 72], sizes = [8, 8], strides = [1, 1]} : vector<16x128xf32> to vector<8x8xf32>
    %119 = vector.extract_strided_slice %5 {offsets = [0, 80], sizes = [8, 8], strides = [1, 1]} : vector<16x128xf32> to vector<8x8xf32>
    %120 = vector.extract_strided_slice %5 {offsets = [0, 88], sizes = [8, 8], strides = [1, 1]} : vector<16x128xf32> to vector<8x8xf32>
    %121 = tpu.transpose %119, [1, 0] : vector<8x8xf32> -> vector<8x8xf32>
    %cst_37 = arith.constant dense<0.000000e+00> : vector<8x8xf32>
    %122 = tpu.matmul %118, %121, %cst_37 {dimension_numbers = #tpu.dot_dimension_numbers<[1], [0], [0], [1], [0, 0, 1, 1], [], []>} : vector<8x8xf32>, vector<8x8xf32>, vector<8x8xf32> -> vector<8x8xf32>
    %123 = vector.broadcast %57 : f32 to vector<8x8xf32>
    %124 = arith.mulf %122, %123 : vector<8x8xf32>
    %125 = vector.extract_strided_slice %55 {offsets = [0, 24], sizes = [8, 8], strides = [1, 1]} : vector<16x32xf32> to vector<8x8xf32>
    %126 = arith.addf %124, %125 : vector<8x8xf32>
    %cst_38 = arith.constant dense<0xFF800000> : vector<8xf32>
    %127 = vector.multi_reduction <maximumf>, %126, %cst_38 [1] : vector<8x8xf32> to vector<8xf32>
    %128 = vector.shape_cast %127 : vector<8xf32> to vector<8x1xf32>
    %129 = vector.broadcast %128 : vector<8x1xf32> to vector<8x8xf32>
    %130 = arith.subf %126, %129 : vector<8x8xf32>
    %131 = math.exp %130 : vector<8x8xf32>
    %cst_39 = arith.constant dense<0.000000e+00> : vector<8xf32>
    %132 = vector.multi_reduction <add>, %131, %cst_39 [1] : vector<8x8xf32> to vector<8xf32>
    %133 = vector.shape_cast %132 : vector<8xf32> to vector<8x1xf32>
    %134 = tpu.reciprocal %133 {approx = true} : vector<8x1xf32> -> vector<8x1xf32>
    %135 = vector.broadcast %134 : vector<8x1xf32> to vector<8x8xf32>
    %136 = arith.mulf %131, %135 : vector<8x8xf32>
    %cst_40 = arith.constant dense<0.000000e+00> : vector<8x8xf32>
    %137 = tpu.matmul %136, %120, %cst_40 {dimension_numbers = #tpu.dot_dimension_numbers<[1], [0], [0], [1], [0, 0, 1, 1], [], []>} : vector<8x8xf32>, vector<8x8xf32>, vector<8x8xf32> -> vector<8x8xf32>
    %138 = tpu.concatenate %77, %97, %117, %137 in 1 : vector<8x8xf32>, vector<8x8xf32>, vector<8x8xf32>, vector<8x8xf32> -> vector<8x32xf32>
    %139 = vector.extract_strided_slice %5 {offsets = [8, 0], sizes = [8, 8], strides = [1, 1]} : vector<16x128xf32> to vector<8x8xf32>
    %140 = vector.extract_strided_slice %5 {offsets = [8, 8], sizes = [8, 8], strides = [1, 1]} : vector<16x128xf32> to vector<8x8xf32>
    %141 = vector.extract_strided_slice %5 {offsets = [8, 16], sizes = [8, 8], strides = [1, 1]} : vector<16x128xf32> to vector<8x8xf32>
    %142 = tpu.transpose %140, [1, 0] : vector<8x8xf32> -> vector<8x8xf32>
    %cst_41 = arith.constant dense<0.000000e+00> : vector<8x8xf32>
    %143 = tpu.matmul %139, %142, %cst_41 {dimension_numbers = #tpu.dot_dimension_numbers<[1], [0], [0], [1], [0, 0, 1, 1], [], []>} : vector<8x8xf32>, vector<8x8xf32>, vector<8x8xf32> -> vector<8x8xf32>
    %144 = vector.broadcast %57 : f32 to vector<8x8xf32>
    %145 = arith.mulf %143, %144 : vector<8x8xf32>
    %146 = vector.extract_strided_slice %55 {offsets = [8, 0], sizes = [8, 8], strides = [1, 1]} : vector<16x32xf32> to vector<8x8xf32>
    %147 = arith.addf %145, %146 : vector<8x8xf32>
    %cst_42 = arith.constant dense<0xFF800000> : vector<8xf32>
    %148 = vector.multi_reduction <maximumf>, %147, %cst_42 [1] : vector<8x8xf32> to vector<8xf32>
    %149 = vector.shape_cast %148 : vector<8xf32> to vector<8x1xf32>
    %150 = vector.broadcast %149 : vector<8x1xf32> to vector<8x8xf32>
    %151 = arith.subf %147, %150 : vector<8x8xf32>
    %152 = math.exp %151 : vector<8x8xf32>
    %cst_43 = arith.constant dense<0.000000e+00> : vector<8xf32>
    %153 = vector.multi_reduction <add>, %152, %cst_43 [1] : vector<8x8xf32> to vector<8xf32>
    %154 = vector.shape_cast %153 : vector<8xf32> to vector<8x1xf32>
    %155 = tpu.reciprocal %154 {approx = true} : vector<8x1xf32> -> vector<8x1xf32>
    %156 = vector.broadcast %155 : vector<8x1xf32> to vector<8x8xf32>
    %157 = arith.mulf %152, %156 : vector<8x8xf32>
    %cst_44 = arith.constant dense<0.000000e+00> : vector<8x8xf32>
    %158 = tpu.matmul %157, %141, %cst_44 {dimension_numbers = #tpu.dot_dimension_numbers<[1], [0], [0], [1], [0, 0, 1, 1], [], []>} : vector<8x8xf32>, vector<8x8xf32>, vector<8x8xf32> -> vector<8x8xf32>
    %159 = vector.extract_strided_slice %5 {offsets = [8, 24], sizes = [8, 8], strides = [1, 1]} : vector<16x128xf32> to vector<8x8xf32>
    %160 = vector.extract_strided_slice %5 {offsets = [8, 32], sizes = [8, 8], strides = [1, 1]} : vector<16x128xf32> to vector<8x8xf32>
    %161 = vector.extract_strided_slice %5 {offsets = [8, 40], sizes = [8, 8], strides = [1, 1]} : vector<16x128xf32> to vector<8x8xf32>
    %162 = tpu.transpose %160, [1, 0] : vector<8x8xf32> -> vector<8x8xf32>
    %cst_45 = arith.constant dense<0.000000e+00> : vector<8x8xf32>
    %163 = tpu.matmul %159, %162, %cst_45 {dimension_numbers = #tpu.dot_dimension_numbers<[1], [0], [0], [1], [0, 0, 1, 1], [], []>} : vector<8x8xf32>, vector<8x8xf32>, vector<8x8xf32> -> vector<8x8xf32>
    %164 = vector.broadcast %57 : f32 to vector<8x8xf32>
    %165 = arith.mulf %163, %164 : vector<8x8xf32>
    %166 = vector.extract_strided_slice %55 {offsets = [8, 8], sizes = [8, 8], strides = [1, 1]} : vector<16x32xf32> to vector<8x8xf32>
    %167 = arith.addf %165, %166 : vector<8x8xf32>
    %cst_46 = arith.constant dense<0xFF800000> : vector<8xf32>
    %168 = vector.multi_reduction <maximumf>, %167, %cst_46 [1] : vector<8x8xf32> to vector<8xf32>
    %169 = vector.shape_cast %168 : vector<8xf32> to vector<8x1xf32>
    %170 = vector.broadcast %169 : vector<8x1xf32> to vector<8x8xf32>
    %171 = arith.subf %167, %170 : vector<8x8xf32>
    %172 = math.exp %171 : vector<8x8xf32>
    %cst_47 = arith.constant dense<0.000000e+00> : vector<8xf32>
    %173 = vector.multi_reduction <add>, %172, %cst_47 [1] : vector<8x8xf32> to vector<8xf32>
    %174 = vector.shape_cast %173 : vector<8xf32> to vector<8x1xf32>
    %175 = tpu.reciprocal %174 {approx = true} : vector<8x1xf32> -> vector<8x1xf32>
    %176 = vector.broadcast %175 : vector<8x1xf32> to vector<8x8xf32>
    %177 = arith.mulf %172, %176 : vector<8x8xf32>
    %cst_48 = arith.constant dense<0.000000e+00> : vector<8x8xf32>
    %178 = tpu.matmul %177, %161, %cst_48 {dimension_numbers = #tpu.dot_dimension_numbers<[1], [0], [0], [1], [0, 0, 1, 1], [], []>} : vector<8x8xf32>, vector<8x8xf32>, vector<8x8xf32> -> vector<8x8xf32>
    %179 = vector.extract_strided_slice %5 {offsets = [8, 48], sizes = [8, 8], strides = [1, 1]} : vector<16x128xf32> to vector<8x8xf32>
    %180 = vector.extract_strided_slice %5 {offsets = [8, 56], sizes = [8, 8], strides = [1, 1]} : vector<16x128xf32> to vector<8x8xf32>
    %181 = vector.extract_strided_slice %5 {offsets = [8, 64], sizes = [8, 8], strides = [1, 1]} : vector<16x128xf32> to vector<8x8xf32>
    %182 = tpu.transpose %180, [1, 0] : vector<8x8xf32> -> vector<8x8xf32>
    %cst_49 = arith.constant dense<0.000000e+00> : vector<8x8xf32>
    %183 = tpu.matmul %179, %182, %cst_49 {dimension_numbers = #tpu.dot_dimension_numbers<[1], [0], [0], [1], [0, 0, 1, 1], [], []>} : vector<8x8xf32>, vector<8x8xf32>, vector<8x8xf32> -> vector<8x8xf32>
    %184 = vector.broadcast %57 : f32 to vector<8x8xf32>
    %185 = arith.mulf %183, %184 : vector<8x8xf32>
    %186 = vector.extract_strided_slice %55 {offsets = [8, 16], sizes = [8, 8], strides = [1, 1]} : vector<16x32xf32> to vector<8x8xf32>
    %187 = arith.addf %185, %186 : vector<8x8xf32>
    %cst_50 = arith.constant dense<0xFF800000> : vector<8xf32>
    %188 = vector.multi_reduction <maximumf>, %187, %cst_50 [1] : vector<8x8xf32> to vector<8xf32>
    %189 = vector.shape_cast %188 : vector<8xf32> to vector<8x1xf32>
    %190 = vector.broadcast %189 : vector<8x1xf32> to vector<8x8xf32>
    %191 = arith.subf %187, %190 : vector<8x8xf32>
    %192 = math.exp %191 : vector<8x8xf32>
    %cst_51 = arith.constant dense<0.000000e+00> : vector<8xf32>
    %193 = vector.multi_reduction <add>, %192, %cst_51 [1] : vector<8x8xf32> to vector<8xf32>
    %194 = vector.shape_cast %193 : vector<8xf32> to vector<8x1xf32>
    %195 = tpu.reciprocal %194 {approx = true} : vector<8x1xf32> -> vector<8x1xf32>
    %196 = vector.broadcast %195 : vector<8x1xf32> to vector<8x8xf32>
    %197 = arith.mulf %192, %196 : vector<8x8xf32>
    %cst_52 = arith.constant dense<0.000000e+00> : vector<8x8xf32>
    %198 = tpu.matmul %197, %181, %cst_52 {dimension_numbers = #tpu.dot_dimension_numbers<[1], [0], [0], [1], [0, 0, 1, 1], [], []>} : vector<8x8xf32>, vector<8x8xf32>, vector<8x8xf32> -> vector<8x8xf32>
    %199 = vector.extract_strided_slice %5 {offsets = [8, 72], sizes = [8, 8], strides = [1, 1]} : vector<16x128xf32> to vector<8x8xf32>
    %200 = vector.extract_strided_slice %5 {offsets = [8, 80], sizes = [8, 8], strides = [1, 1]} : vector<16x128xf32> to vector<8x8xf32>
    %201 = vector.extract_strided_slice %5 {offsets = [8, 88], sizes = [8, 8], strides = [1, 1]} : vector<16x128xf32> to vector<8x8xf32>
    %202 = tpu.transpose %200, [1, 0] : vector<8x8xf32> -> vector<8x8xf32>
    %cst_53 = arith.constant dense<0.000000e+00> : vector<8x8xf32>
    %203 = tpu.matmul %199, %202, %cst_53 {dimension_numbers = #tpu.dot_dimension_numbers<[1], [0], [0], [1], [0, 0, 1, 1], [], []>} : vector<8x8xf32>, vector<8x8xf32>, vector<8x8xf32> -> vector<8x8xf32>
    %204 = vector.broadcast %57 : f32 to vector<8x8xf32>
    %205 = arith.mulf %203, %204 : vector<8x8xf32>
    %206 = vector.extract_strided_slice %55 {offsets = [8, 24], sizes = [8, 8], strides = [1, 1]} : vector<16x32xf32> to vector<8x8xf32>
    %207 = arith.addf %205, %206 : vector<8x8xf32>
    %cst_54 = arith.constant dense<0xFF800000> : vector<8xf32>
    %208 = vector.multi_reduction <maximumf>, %207, %cst_54 [1] : vector<8x8xf32> to vector<8xf32>
    %209 = vector.shape_cast %208 : vector<8xf32> to vector<8x1xf32>
    %210 = vector.broadcast %209 : vector<8x1xf32> to vector<8x8xf32>
    %211 = arith.subf %207, %210 : vector<8x8xf32>
    %212 = math.exp %211 : vector<8x8xf32>
    %cst_55 = arith.constant dense<0.000000e+00> : vector<8xf32>
    %213 = vector.multi_reduction <add>, %212, %cst_55 [1] : vector<8x8xf32> to vector<8xf32>
    %214 = vector.shape_cast %213 : vector<8xf32> to vector<8x1xf32>
    %215 = tpu.reciprocal %214 {approx = true} : vector<8x1xf32> -> vector<8x1xf32>
    %216 = vector.broadcast %215 : vector<8x1xf32> to vector<8x8xf32>
    %217 = arith.mulf %212, %216 : vector<8x8xf32>
    %cst_56 = arith.constant dense<0.000000e+00> : vector<8x8xf32>
    %218 = tpu.matmul %217, %201, %cst_56 {dimension_numbers = #tpu.dot_dimension_numbers<[1], [0], [0], [1], [0, 0, 1, 1], [], []>} : vector<8x8xf32>, vector<8x8xf32>, vector<8x8xf32> -> vector<8x8xf32>
    %219 = tpu.concatenate %158, %178, %198, %218 in 1 : vector<8x8xf32>, vector<8x8xf32>, vector<8x8xf32>, vector<8x8xf32> -> vector<8x32xf32>
    %220 = tpu.concatenate %138, %219 in 0 : vector<8x32xf32>, vector<8x32xf32> -> vector<16x32xf32>
    %c216 = arith.constant 216 : index
    %c0_57 = arith.constant 0 : index
    %221 = vector.load %arg2[%c216, %c0_57] : memref<352x128xf32, #tpu.memory_space<vmem>>, vector<32x16xf32>
    %cst_58 = arith.constant dense<0.000000e+00> : vector<16x16xf32>
    %222 = tpu.matmul %220, %221, %cst_58 {dimension_numbers = #tpu.dot_dimension_numbers<[1], [0], [0], [1], [0, 0, 1, 1], [], []>} : vector<16x32xf32>, vector<32x16xf32>, vector<16x16xf32> -> vector<16x16xf32>
    %c248 = arith.constant 248 : index
    %c0_59 = arith.constant 0 : index
    %223 = vector.load %arg2[%c248, %c0_59] : memref<352x128xf32, #tpu.memory_space<vmem>>, vector<1x16xf32>
    %224 = vector.broadcast %223 : vector<1x16xf32> to vector<16x16xf32>
    %225 = arith.addf %222, %224 : vector<16x16xf32>
    %226 = arith.addf %225, %0 : vector<16x16xf32>
    %c256 = arith.constant 256 : index
    %c0_60 = arith.constant 0 : index
    %227 = vector.load %arg2[%c256, %c0_60] : memref<352x128xf32, #tpu.memory_space<vmem>>, vector<1x16xf32>
    %c264 = arith.constant 264 : index
    %c0_61 = arith.constant 0 : index
    %228 = vector.load %arg2[%c264, %c0_61] : memref<352x128xf32, #tpu.memory_space<vmem>>, vector<1x16xf32>
    %cst_62 = arith.constant dense<0.000000e+00> : vector<16xf32>
    %229 = vector.multi_reduction <add>, %226, %cst_62 [1] : vector<16x16xf32> to vector<16xf32>
    %230 = vector.shape_cast %229 : vector<16xf32> to vector<16x1xf32>
    %cst_63 = arith.constant 1.600000e+01 : f32
    %231 = vector.broadcast %cst_63 : f32 to vector<16x1xf32>
    %232 = arith.divf %230, %231 : vector<16x1xf32>
    %233 = vector.broadcast %232 : vector<16x1xf32> to vector<16x16xf32>
    %234 = arith.subf %226, %233 : vector<16x16xf32>
    %235 = arith.mulf %234, %234 : vector<16x16xf32>
    %cst_64 = arith.constant dense<0.000000e+00> : vector<16xf32>
    %236 = vector.multi_reduction <add>, %235, %cst_64 [1] : vector<16x16xf32> to vector<16xf32>
    %237 = vector.shape_cast %236 : vector<16xf32> to vector<16x1xf32>
    %cst_65 = arith.constant 1.600000e+01 : f32
    %238 = vector.broadcast %cst_65 : f32 to vector<16x1xf32>
    %239 = arith.divf %237, %238 : vector<16x1xf32>
    %240 = vector.broadcast %232 : vector<16x1xf32> to vector<16x16xf32>
    %241 = arith.subf %226, %240 : vector<16x16xf32>
    %cst_66 = arith.constant 9.99999974E-6 : f32
    %242 = vector.broadcast %cst_66 : f32 to vector<16x1xf32>
    %243 = arith.addf %239, %242 : vector<16x1xf32>
    %244 = math.rsqrt %243 : vector<16x1xf32>
    %245 = vector.broadcast %244 : vector<16x1xf32> to vector<16x16xf32>
    %246 = arith.mulf %241, %245 : vector<16x16xf32>
    %247 = vector.broadcast %227 : vector<1x16xf32> to vector<16x16xf32>
    %248 = arith.mulf %246, %247 : vector<16x16xf32>
    %249 = vector.broadcast %228 : vector<1x16xf32> to vector<16x16xf32>
    %250 = arith.addf %248, %249 : vector<16x16xf32>
    %c272 = arith.constant 272 : index
    %c0_67 = arith.constant 0 : index
    %251 = vector.load %arg2[%c272, %c0_67] : memref<352x128xf32, #tpu.memory_space<vmem>>, vector<16x32xf32>
    %cst_68 = arith.constant dense<0.000000e+00> : vector<16x32xf32>
    %252 = tpu.matmul %250, %251, %cst_68 {dimension_numbers = #tpu.dot_dimension_numbers<[1], [0], [0], [1], [0, 0, 1, 1], [], []>} : vector<16x16xf32>, vector<16x32xf32>, vector<16x32xf32> -> vector<16x32xf32>
    %c288 = arith.constant 288 : index
    %c0_69 = arith.constant 0 : index
    %253 = vector.load %arg2[%c288, %c0_69] : memref<352x128xf32, #tpu.memory_space<vmem>>, vector<1x32xf32>
    %254 = vector.broadcast %253 : vector<1x32xf32> to vector<16x32xf32>
    %255 = arith.addf %252, %254 : vector<16x32xf32>
    %cst_70 = arith.constant 0.000000e+00 : f32
    %256 = vector.broadcast %cst_70 : f32 to vector<16x32xf32>
    %257 = arith.maximumf %255, %256 : vector<16x32xf32>
    %c296 = arith.constant 296 : index
    %c0_71 = arith.constant 0 : index
    %258 = vector.load %arg2[%c296, %c0_71] : memref<352x128xf32, #tpu.memory_space<vmem>>, vector<32x16xf32>
    %cst_72 = arith.constant dense<0.000000e+00> : vector<16x16xf32>
    %259 = tpu.matmul %257, %258, %cst_72 {dimension_numbers = #tpu.dot_dimension_numbers<[1], [0], [0], [1], [0, 0, 1, 1], [], []>} : vector<16x32xf32>, vector<32x16xf32>, vector<16x16xf32> -> vector<16x16xf32>
    %c328 = arith.constant 328 : index
    %c0_73 = arith.constant 0 : index
    %260 = vector.load %arg2[%c328, %c0_73] : memref<352x128xf32, #tpu.memory_space<vmem>>, vector<1x16xf32>
    %261 = vector.broadcast %260 : vector<1x16xf32> to vector<16x16xf32>
    %262 = arith.addf %259, %261 : vector<16x16xf32>
    %263 = arith.addf %262, %250 : vector<16x16xf32>
    %c336 = arith.constant 336 : index
    %c0_74 = arith.constant 0 : index
    %264 = vector.load %arg2[%c336, %c0_74] : memref<352x128xf32, #tpu.memory_space<vmem>>, vector<1x16xf32>
    %c344 = arith.constant 344 : index
    %c0_75 = arith.constant 0 : index
    %265 = vector.load %arg2[%c344, %c0_75] : memref<352x128xf32, #tpu.memory_space<vmem>>, vector<1x16xf32>
    %cst_76 = arith.constant dense<0.000000e+00> : vector<16xf32>
    %266 = vector.multi_reduction <add>, %263, %cst_76 [1] : vector<16x16xf32> to vector<16xf32>
    %267 = vector.shape_cast %266 : vector<16xf32> to vector<16x1xf32>
    %cst_77 = arith.constant 1.600000e+01 : f32
    %268 = vector.broadcast %cst_77 : f32 to vector<16x1xf32>
    %269 = arith.divf %267, %268 : vector<16x1xf32>
    %270 = vector.broadcast %269 : vector<16x1xf32> to vector<16x16xf32>
    %271 = arith.subf %263, %270 : vector<16x16xf32>
    %272 = arith.mulf %271, %271 : vector<16x16xf32>
    %cst_78 = arith.constant dense<0.000000e+00> : vector<16xf32>
    %273 = vector.multi_reduction <add>, %272, %cst_78 [1] : vector<16x16xf32> to vector<16xf32>
    %274 = vector.shape_cast %273 : vector<16xf32> to vector<16x1xf32>
    %cst_79 = arith.constant 1.600000e+01 : f32
    %275 = vector.broadcast %cst_79 : f32 to vector<16x1xf32>
    %276 = arith.divf %274, %275 : vector<16x1xf32>
    %277 = vector.broadcast %269 : vector<16x1xf32> to vector<16x16xf32>
    %278 = arith.subf %263, %277 : vector<16x16xf32>
    %cst_80 = arith.constant 9.99999974E-6 : f32
    %279 = vector.broadcast %cst_80 : f32 to vector<16x1xf32>
    %280 = arith.addf %276, %279 : vector<16x1xf32>
    %281 = math.rsqrt %280 : vector<16x1xf32>
    %282 = vector.broadcast %281 : vector<16x1xf32> to vector<16x16xf32>
    %283 = arith.mulf %278, %282 : vector<16x16xf32>
    %284 = vector.broadcast %264 : vector<1x16xf32> to vector<16x16xf32>
    %285 = arith.mulf %283, %284 : vector<16x16xf32>
    %286 = vector.broadcast %265 : vector<1x16xf32> to vector<16x16xf32>
    %287 = arith.addf %285, %286 : vector<16x16xf32>
    %c0_81 = arith.constant 0 : index
    %c0_82 = arith.constant 0 : index
    %288 = vector.load %arg3[%c0_81, %c0_82] : memref<16x16xf32, #tpu.memory_space<vmem>>, vector<16x16xf32>
    tpu.vector_store %arg3[%c0_81, %c0_82], %287 {strides = array<i32>} : memref<16x16xf32, #tpu.memory_space<vmem>>, vector<16x16xf32>,
    return
  }
  func.func @transform_0(%arg0: i32) -> (i32, i32) {
    %c0_i32 = arith.constant 0 : i32
    %c0_i32_0 = arith.constant 0 : i32
    %c0_i32_1 = arith.constant 0 : i32
    return %c0_i32, %c0_i32_0 : i32, i32
  }
  func.func @transform_1(%arg0: i32) -> (i32, i32) {
    %c0_i32 = arith.constant 0 : i32
    %c0_i32_0 = arith.constant 0 : i32
    %c0_i32_1 = arith.constant 0 : i32
    return %c0_i32, %c0_i32_0 : i32, i32
  }
  func.func @transform_2(%arg0: i32) -> (i32, i32) {
    %c0_i32 = arith.constant 0 : i32
    %c0_i32_0 = arith.constant 0 : i32
    %c0_i32_1 = arith.constant 0 : i32
    return %c0_i32, %c0_i32_0 : i32, i32
  }
}

</mosaic_0001>

<bundles_post_ra>
// kernel: tpu_custom_call.1
= control target key start
LH: loop header
LB: loop body
LE: loop exit
PB: predicated region body
PF: predicated region fallthrough
CT: control target
= control target key end

     0   :  { %7 = vsyncpa [#allocation3], 0  ;;  %s3058_s0 = inlined_call_operand.hbm [shape: f32[16,16], index: 0, kind: input, shape index: {}]   ;;  %s3059_s1 = inlined_call_operand.hbm [shape: f32[352,128], index: 1, kind: input, shape index: {}]   ;;  %s3060_s2 = inlined_call_operand.hbm [shape: f32[16,16], index: 2, kind: output, shape index: {}]  }
   0x1   :  { %8 = vsyncpa [#allocation6], 0 }
   0x2   :  { %9 = vsyncpa [#allocation4], 0  ;;  %s2789_s9 = smov [#allocation2]  }
   0x3   :  { %s15_s10 = sshll.u32 %s2789_s9, 4  ;;  %s16_s10 = int_to_ptr.vmem [resolvable:$true] %s15_s10 }
   0x4   :  { %s2731_s11 = scalar_lea.vmem %s16_s10, 256  ;;  %p2736_p1 = scmp.lt.s32.totalorder %s16_s10, %s16_s10 }
   0x5   :  { %p2732_p0 = scmp.ne.s32.totalorder %s16_s10, %s2731_s11  ;;  %p2737_p2 = scmp.lt.s32.totalorder %s2731_s11, %s2731_s11 }
   0x7   :  { %p2738_p3 = por %p2737_p2, %p2736_p1 }
   0x9   :  { %p2739_p4 = pnand %p2738_p3, %p2732_p0 }
   0xb   :  { %2742 = shalt.err (!%p2739_p4)
}
   0xc   :  { %s2790_s12 = smov 128   ;;  %s2791_s13 = smov 8  }
   0xd   :  { %21 = dma.hbm_to_vmem [thread:$0]  %s3058_s0, 256, %s16_s10, [#allocation3], %s2790_s12, %s2790_s12, %s2791_s13  }
   0xe   :  { %s2792_s16 = smov [#allocation5]  }
   0xf   :  { %s27_s17 = sshll.u32 %s2792_s16, 4  ;;  %s28_s17 = int_to_ptr.vmem [resolvable:$true] %s27_s17 }
  0x10   :  { %s2751_s18 = scalar_lea.vmem %s28_s17, 5632  ;;  %p2756_p6 = scmp.lt.s32.totalorder %s28_s17, %s28_s17 }
  0x11   :  { %p2752_p5 = scmp.ne.s32.totalorder %s28_s17, %s2751_s18  ;;  %p2757_p7 = scmp.lt.s32.totalorder %s2751_s18, %s2751_s18 }
  0x13   :  { %p2758_p8 = por %p2757_p7, %p2756_p6 }
  0x15   :  { %p2759_p9 = pnand %p2758_p8, %p2752_p5 }
  0x17   :  { %2762 = shalt.err (!%p2759_p9)
}
  0x18   :  { %33 = dma.hbm_to_vmem [thread:$0]  %s3059_s1, 5632, %s28_s17, [#allocation6], %s2790_s12, %s2790_s12, %s2791_s13  }
  0x19   :  { %2783 = dma.done.wait [#allocation3], 256  }
  0x1a   :  { %2784 = vsyncadd [#allocation3], 4294967040 }
  0x1b   :  { %2785 = dma.done.wait [#allocation6], 5632  }
  0x1c   :  { %2786 = vsyncadd [#allocation6], 4294961664  ;;  %vm49_vm0 = vcmask 130048   ;;  %v43_v0 = vld [vmem:[#allocation5 + $0x8] sm:$0xff]  ;;  %v42_v1 = vld [vmem:[#allocation5] sm:$0xff]  ;;  %s2793_s0 = smov 32  }
  0x1d   :  { %v2837_v2 = vld [vmem:[#allocation2] sm:$0xff]  ;;  %2474 = vmatprep.subr.mxu0 %v43_v0  ;;  %v2841_v3 = vld [vmem:[#allocation2 + $0x8] sm:$0xff]  ;;  %v2338_v25 = vld [vmem:[#allocation5 + $0x20] ss:$0 sm:$0xff]  ;;  %s2794_s1 = smov 96   ;;  %s2795_s21 = smov 120  }
  0x1e   :  { %2478 = vmatprep.mubr.msk.f32.mxu0 %vm49_vm0, %v2837_v2  ;;  %2475 = vmatpush3.msra.mxu0 %v43_v0  ;;  %v2334_v5 = vld [vmem:[#allocation5 + $0x10] ss:$0 sm:$0xff]  ;;  %v2337_v26 = vld [vmem:[#allocation5 + $0x18] ss:$0 sm:$0xff]  ;;  %v196_v34 = vld [vmem:[#allocation5 + $0x28] sm:$0xff]  ;;  %vm296_vm1 = vcmask 523264  }
  0x1f   :  { %2476 = vmatprep.subr.mxu0 %v42_v1  ;;  %v197_v33 = vld [vmem:[#allocation5 + $0x30] sm:$0xff]  ;;  %v295_v38 = vld [vmem:[#allocation5 + $0x78] sm:$0xff]  ;;  %v293_v41 = vld [vmem:[#allocation5 + $0x68] sm:$0xff]  ;;  %v2796_v60 = vmov 0.0   ;;  %vm577_vm2 = vcmask 64512   ;;  %vm2797_vm3 = vmmov 0  }
  0x20   :  { %2477 = vmatpush3.msra.mxu0 %v42_v1  ;;  %2481 = vmatprep.subr.mxu1 %v197_v33  ;;  %v294_v39 = vld [vmem:[#allocation5 + $0x70] sm:$0xff]  ;;  %v292_v46 = vld [vmem:[#allocation5 + $0x60] sm:$0xff]  ;;  %v291_v48 = vld [vmem:[#allocation5 + $0x58] sm:$0xff]  ;;  %s2798_s22 = smov 112   ;;  %s2799_s23 = smov 104   ;;  %vm1266_vm4 = vcmask 195584  }
  0x21   :  { %2479 = vmatmul.mubr.msk.f32.vlgmr.msra.gmra.mxu0 %vm49_vm0, %v2841_v3  ;;  %2482 = vmatpush3.msra.mxu1 %v197_v33  ;;  %v290_v52 = vld [vmem:[#allocation5 + $0x50] sm:$0xff]  ;;  %v289_v53 = vld [vmem:[#allocation5 + $0x48] sm:$0xff]  ;;  %v288_v54 = vld [vmem:[#allocation5 + $0x40] sm:$0xff]  ;;  %s2800_s24 = smov 80   ;;  %s2801_s25 = smov 56   ;;  %vm1968_vm5 = vcmask 261120  }
  0x22   :  { %2483 = vmatprep.subr.mxu1 %v196_v34  ;;  %2488 = vmatprep.subr.mxu0 %v295_v38  ;;  %v2339_v56 = vld [vmem:[#allocation5 + $0x38] ss:$0 sm:$0xff]  ;;  %v2348_v33 = vld [vmem:[#allocation5 + $0xd0] ss:$0 sm:$0xff]  ;;  %s2802_s26 = smov 72   ;;  %s2803_s27 = smov 48  }
  0x23   :  { %2484 = vmatpush3.msra.mxu1 %v196_v34  ;;  %2489 = vmatpush3.msra.mxu0 %v295_v38  ;;  %s2804_s28 = smov 88   ;;  %s2805_s29 = smov 40  }
  0x24   :  { %2507 = vmatprep.subr.mxu1 %v295_v38  ;;  %2490 = vmatprep.subr.mxu0 %v294_v39  ;;  %s2806_s30 = smov 64   ;;  %s2807_s3 = smov 16  }
  0x25   :  { %2491 = vmatpush3.msra.mxu0 %v294_v39  ;;  %s2808_s4 = smov 24   ;;  %s2809_s5 = smov [#allocation7]  }
  0x26   :  { %2492 = vmatprep.subr.mxu0 %v293_v41  ;;  %s2321_s6 = sshll.u32 %s2809_s5, 4  ;;  %s2322_s6 = int_to_ptr.vmem [resolvable:$true] %s2321_s6 }
  0x27   :  { %2493 = vmatpush3.msra.mxu0 %v293_v41  ;;  %s2763_s7 = scalar_lea.vmem %s2322_s6, 256  ;;  %p2768_p11 = scmp.lt.s32.totalorder %s2322_s6, %s2322_s6 }
  0x28   :  { %2494 = vmatprep.subr.mxu0 %v292_v46  ;;  %p2764_p10 = scmp.ne.s32.totalorder %s2322_s6, %s2763_s7  ;;  %p2769_p12 = scmp.lt.s32.totalorder %s2763_s7, %s2763_s7 }
  0x29   :  { %2495 = vmatpush3.msra.mxu0 %v292_v46 }
  0x2a   :  { %2496 = vmatprep.subr.mxu0 %v291_v48  ;;  %p2770_p13 = por %p2769_p12, %p2768_p11 }
  0x2b   :  { %2497 = vmatpush3.msra.mxu0 %v291_v48 }
  0x2c   :  { %2498 = vmatprep.subr.mxu0 %v290_v52  ;;  %p2771_p0 = pnand %p2770_p13, %p2764_p10 }
  0x2d   :  { %2499 = vmatpush3.msra.mxu0 %v290_v52 }
  0x2e   :  { %2500 = vmatprep.subr.mxu0 %v289_v53 }
  0x2f   :  { %2501 = vmatpush3.msra.mxu0 %v289_v53 }
  0x30   :  { %2502 = vmatprep.subr.mxu0 %v288_v54 }
  0x31   :  { %2503 = vmatpush3.msra.mxu0 %v288_v54 }
  0xe1   :  { %v2480_v4 = vpop.f32.mrf.mxu0 }
  0xe2   :  { %v2849_v8 = vadd.f32 %v2480_v4, %v2334_v5 }
  0xe3   :  { %v122_v6 = vpop.f32.mrf.mxu0 }
  0xe4   :  { %v2845_v7 = vadd.f32 %v2334_v5, %v122_v6  ;;  %v488_v6 = vld [vmem:[#allocation5 + $0xc8] sm:$0xff] }
  0xe5   :  { %2526 = vmatprep.subr.mxu0 %v488_v6 }
  0xe6   :  { %135 = vrot.lane.b32.xlu0 %v2845_v7, %s2793_s0 }
  0xea   :  { %137 = vrot.lane.b32.xlu0 %v2849_v8, %s2793_s0 }
 0x158   :  { %v136_v9 = vpop.permute.xlu0 %135 }
 0x159   :  { %v141_v10 = vsel %vm49_vm0, %v136_v9, 0.0  ;;  %v487_v9 = vld [vmem:[#allocation5 + $0xc0] sm:$0xff] }
 0x15a   :  { %142 = vadd.xlane.f32.xlu1 %v141_v10  ;;  %v486_v10 = vld [vmem:[#allocation5 + $0xb8] sm:$0xff] }
 0x15c   :  { %v138_v11 = vpop.permute.xlu0 %137 }
 0x15d   :  { %v144_v12 = vsel %vm49_vm0, %v138_v11, 0.0  ;;  %v485_v11 = vld [vmem:[#allocation5 + $0xb0] sm:$0xff] }
 0x15e   :  { %145 = vadd.xlane.f32.xlu1 %v144_v12  ;;  %v484_v12 = vld [vmem:[#allocation5 + $0xa8] sm:$0xff] }
 0x1e3   :  { %v143_v13 = vpop.xlane.xlu1 %142 }
 0x1e4   :  { %v148_v14 = vmul.f32 0.0625, %v143_v13  ;;  %v483_v13 = vld [vmem:[#allocation5 + $0xa0] sm:$0xff] }
 0x1e6   :  { %v150_v15 = vsub.f32 %v2845_v7, %v148_v14  ;;  %v482_v14 = vld [vmem:[#allocation5 + $0x98] sm:$0xff] }
 0x1e7   :  { %v146_v16 = vpop.xlane.xlu1 %145 }
 0x1e8   :  { %v149_v17 = vmul.f32 0.0625, %v146_v16  ;;  %v152_v18 = vmul.f32 %v150_v15, %v150_v15 }
 0x1ea   :  { %v151_v19 = vsub.f32 %v2849_v8, %v149_v17  ;;  %156 = vrot.lane.b32.xlu0 %v152_v18, %s2793_s0 }
 0x1ec   :  { %v153_v20 = vmul.f32 %v151_v19, %v151_v19 }
 0x1ee   :  { %158 = vrot.lane.b32.xlu1 %v153_v20, %s2793_s0 }
 0x25c   :  { %v157_v21 = vpop.permute.xlu0 %156 }
 0x25d   :  { %v162_v22 = vsel %vm49_vm0, %v157_v21, 0.0 }
 0x25e   :  { %163 = vadd.xlane.f32.xlu0 %v162_v22 }
 0x260   :  { %v159_v23 = vpop.permute.xlu1 %158 }
 0x261   :  { %v165_v24 = vsel %vm49_vm0, %v159_v23, 0.0 }
 0x262   :  { %166 = vadd.xlane.f32.xlu1 %v165_v24  ;;  %v2346_v24 = vld [vmem:[#allocation5 + $0x80] ss:$0 sm:$0xff] }
 0x273   :  { %191 = vrot.lane.b32.xlu1 %v2338_v25, %s2794_s1 }
 0x274   :  { %181 = vrot.lane.b32.xlu0 %v2337_v26, %s2794_s1 }
 0x277   :  { %743 = vrot.lane.b32.xlu1 %v2845_v7, %s2794_s1 }
 0x2e7   :  { %v164_v27 = vpop.xlane.xlu0 %163 }
 0x2e8   :  { %v168_v28 = vmul.f32 0.0625, %v164_v27 }
 0x2ea   :  { %v170_v29 = vadd.f32 1e-05, %v168_v28 }
 0x2eb   :  { %v167_v30 = vpop.xlane.xlu1 %166  ;;  %v182_v36 = vpop.permute.xlu0 %181 }
 0x2ec   :  { %2675 = vrsqrt.f32 %v170_v29  ;;  %v169_v31 = vmul.f32 0.0625, %v167_v30  ;;  %v2347_v29 = vld [vmem:[#allocation5 + $0x88] ss:$0 sm:$0xff] }
 0x2ee   :  { %v171_v32 = vadd.f32 1e-05, %v169_v31 }
 0x2ef   :  { %v192_v43 = vpop.permute.xlu1 %191 }
 0x2f0   :  { %2677 = vrsqrt.f32 %v171_v32 }
 0x2f9   :  { %v2676_v35 = vpop.eup %2675 }
 0x2fa   :  { %v174_v37 = vmul.f32 %v2676_v35, %v150_v15  ;;  %v481_v15 = vld [vmem:[#allocation5 + $0x90] sm:$0xff] }
 0x2fc   :  { %v184_v40 = vmul.f32 %v182_v36, %v174_v37 }
 0x2fd   :  { %v2678_v42 = vpop.eup %2677 }
 0x2fe   :  { %v175_v44 = vmul.f32 %v2678_v42, %v151_v19  ;;  %v194_v45 = vadd.f32 %v192_v43, %v184_v40 }
 0x300   :  { %v185_v47 = vmul.f32 %v182_v36, %v175_v44  ;;  %205 = vrot.lane.b32.xlu0 %v194_v45, %s2793_s0 }
 0x302   :  { %v195_v49 = vadd.f32 %v192_v43, %v185_v47  ;;  %v744_v47 = vpop.permute.xlu1 %743 }
 0x304   :  { %207 = vrot.lane.b32.xlu0 %v195_v49, %s2793_s0 }
 0x308   :  { %575 = vrot.lane.b32.xlu0 %v2845_v7, %s2795_s21 }
 0x372   :  { %v206_v50 = vpop.permute.xlu0 %205 }
 0x373   :  { %2485 = vmatprep.mubr.msk.f32.mxu1 %vm49_vm0, %v206_v50 }
 0x376   :  { %v208_v51 = vpop.permute.xlu0 %207 }
 0x377   :  { %2486 = vmatmul.mubr.msk.f32.vlgmr.msra.gmra.mxu1 %vm49_vm0, %v208_v51 }
 0x378   :  { %2508 = vmatpush3.msra.mxu1 %v295_v38 }
 0x379   :  { %2509 = vmatprep.subr.mxu1 %v294_v39 }
 0x37a   :  { %2510 = vmatpush3.msra.mxu1 %v294_v39  ;;  %v576_v5 = vpop.permute.xlu0 %575 }
 0x37b   :  { %2511 = vmatprep.subr.mxu1 %v293_v41 }
 0x37c   :  { %2512 = vmatpush3.msra.mxu1 %v293_v41 }
 0x37d   :  { %2513 = vmatprep.subr.mxu1 %v292_v46 }
 0x37e   :  { %2514 = vmatpush3.msra.mxu1 %v292_v46 }
 0x37f   :  { %2515 = vmatprep.subr.mxu1 %v291_v48 }
 0x380   :  { %2516 = vmatpush3.msra.mxu1 %v291_v48 }
 0x381   :  { %2517 = vmatprep.subr.mxu1 %v290_v52 }
 0x382   :  { %2518 = vmatpush3.msra.mxu1 %v290_v52 }
 0x383   :  { %2519 = vmatprep.subr.mxu1 %v289_v53 }
 0x384   :  { %2520 = vmatpush3.msra.mxu1 %v289_v53 }
 0x385   :  { %2521 = vmatprep.subr.mxu1 %v288_v54 }
 0x386   :  { %2522 = vmatpush3.msra.mxu1 %v288_v54 }
 0x387   :  { %2545 = vmatprep.subr.mxu1 %v2796_v60 }
 0x437   :  { %v2487_v55 = vpop.f32.mrf.mxu1 }
 0x438   :  { %v285_v59 = vadd.f32 %v2487_v55, %v2339_v56 }
 0x439   :  { %v279_v57 = vpop.f32.mrf.mxu1 }
 0x43a   :  { %v280_v58 = vadd.f32 %v2339_v56, %v279_v57 }
 0x43c   :  { %2504 = vmatprep.mubr.msk.f32.mxu0 %vm296_vm1, %v280_v58 }
 0x43d   :  { %2505 = vmatmul.mubr.msk.f32.vlgmr.msra.gmra.mxu0 %vm296_vm1, %v285_v59 }
 0x43e   :  { %2527 = vmatpush3.msra.mxu0 %v488_v6 }
 0x43f   :  { %2528 = vmatprep.subr.mxu0 %v487_v9 }
 0x440   :  { %2529 = vmatpush3.msra.mxu0 %v487_v9 }
 0x441   :  { %2530 = vmatprep.subr.mxu0 %v486_v10 }
 0x442   :  { %2531 = vmatpush3.msra.mxu0 %v486_v10 }
 0x443   :  { %2532 = vmatprep.subr.mxu0 %v485_v11 }
 0x444   :  { %2533 = vmatpush3.msra.mxu0 %v485_v11 }
 0x445   :  { %2534 = vmatprep.subr.mxu0 %v484_v12 }
 0x446   :  { %2535 = vmatpush3.msra.mxu0 %v484_v12 }
 0x447   :  { %2536 = vmatprep.subr.mxu0 %v483_v13 }
 0x448   :  { %2537 = vmatpush3.msra.mxu0 %v483_v13 }
 0x449   :  { %2538 = vmatprep.subr.mxu0 %v482_v14 }
 0x44a   :  { %2539 = vmatpush3.msra.mxu0 %v482_v14 }
 0x44b   :  { %2540 = vmatprep.subr.mxu0 %v481_v15 }
 0x44c   :  { %2541 = vmatpush3.msra.mxu0 %v481_v15 }
 0x44d   :  { %2565 = vmatprep.subr.mxu0 %v2796_v60 }
 0x4fd   :  { %v2506_v61 = vpop.f32.mrf.mxu0 }
 0x4fe   :  { %v379_v62 = vsub.f32 %v285_v59, %v2506_v61 }
 0x4ff   :  { %v369_v63 = vpop.f32.mrf.mxu0 }
 0x500   :  { %v378_v0 = vsub.f32 %v280_v58, %v369_v63  ;;  %v381_v4 = vmul.f32 %v379_v62, %v379_v62 }
 0x502   :  { %v380_v1 = vmul.f32 %v378_v0, %v378_v0 }
 0x504   :  { %2523 = vmatprep.mubr.msk.f32.mxu1 %vm296_vm1, %v380_v1 }
 0x505   :  { %2524 = vmatmul.mubr.msk.f32.vlgmr.msra.gmra.mxu1 %vm296_vm1, %v381_v4 }
 0x506   :  { %2546 = vmatpush3.xpose.msk.msra.mxu1 %vm577_vm2, %v576_v5  ;;  %2547 = vmatprep.mubr.msk.f32.mxu1 %vm2797_vm3, %v2796_v60 }
 0x507   :  { %2550 = vmatprep.subr.mxu1 %v2796_v60 }
 0x509   :  { %2548 = vmatmul.mubr.msk.f32.vlgmr.msra.gmra.mxu1 %vm577_vm2, %v2845_v7 }
 0x50a   :  { %2552 = vmatprep.mubr.msk.f32.mxu1 %vm2797_vm3, %v2796_v60 }
 0x5c5   :  { %v2525_v16 = vpop.f32.mrf.mxu1 }
 0x5c6   :  { %v460_v17 = vadd.f32 1e-05, %v2525_v16 }
 0x5c7   :  { %v454_v18 = vpop.f32.mrf.mxu1 }
 0x5c8   :  { %2679 = vrsqrt.f32 %v460_v17  ;;  %v455_v19 = vadd.f32 1e-05, %v454_v18 }
 0x5c9   :  { %v648_v20 = vpop.f32.mrf.mxu1 }
 0x5ca   :  { %2681 = vrsqrt.f32 %v455_v19  ;;  %v652_v35 = vmul.f32 0.35355338, %v648_v20 }
 0x5cb   :  { %v2549_v21 = vpop.f32.mrf.mxu1 }
 0x5d5   :  { %v2680_v22 = vpop.eup %2679 }
 0x5d6   :  { %v466_v23 = vmul.f32 %v2680_v22, %v379_v62 }
 0x5d7   :  { %v2682_v25 = vpop.eup %2681 }
 0x5d8   :  { %v465_v26 = vmul.f32 %v2682_v25, %v378_v0  ;;  %v473_v27 = vmul.f32 %v2346_v24, %v466_v23 }
 0x5da   :  { %v472_v28 = vmul.f32 %v2346_v24, %v465_v26  ;;  %v480_v31 = vadd.f32 %v2347_v29, %v473_v27 }
 0x5dc   :  { %v479_v30 = vadd.f32 %v2347_v29, %v472_v28 }
 0x5de   :  { %2542 = vmatprep.mubr.msk.f32.mxu0 %vm296_vm1, %v479_v30 }
 0x5df   :  { %2543 = vmatmul.mubr.msk.f32.vlgmr.msra.gmra.mxu0 %vm296_vm1, %v480_v31 }
 0x5e0   :  { %2567 = vmatprep.mubr.msk.f32.mxu0 %vm2797_vm3, %v2796_v60 }
 0x69f   :  { %v2544_v32 = vpop.f32.mrf.mxu0 }
 0x6a0   :  { %v2902_v39 = vadd.f32 %v2544_v32, %v2348_v33 }
 0x6a1   :  { %v566_v34 = vpop.f32.mrf.mxu0 }
 0x6a2   :  { %v567_v36 = vadd.f32 %v2348_v33, %v566_v34 }
 0x6a4   :  { %v653_v37 = vadd.f32 %v652_v35, %v567_v36 }
 0x6a6   :  { %v654_v38 = vsel %vm577_vm2, %v653_v37, -inf }
 0x6a7   :  { %655 = vmax.xlane.f32.xlu0 %v654_v38 }
 0x6bd   :  { %665 = vrot.lane.b32.xlu0 %v2845_v7, %s2798_s22 }
 0x6c1   :  { %741 = vrot.lane.b32.xlu0 %v2845_v7, %s2799_s23 }
 0x6c5   :  { %912 = vrot.lane.b32.xlu0 %v2845_v7, %s2800_s24 }
 0x6c9   :  { %1082 = vrot.lane.b32.xlu0 %v2845_v7, %s2801_s25 }
 0x6cd   :  { %1435 = vrot.lane.b32.xlu0 %v2849_v8, %s2794_s1 }
 0x6d1   :  { %1606 = vrot.lane.b32.xlu0 %v2849_v8, %s2802_s26 }
 0x6d5   :  { %1776 = vrot.lane.b32.xlu0 %v2849_v8, %s2803_s27 }
 0x6d9   :  { %821 = vrot.lane.b32.xlu0 %v567_v36, %s2795_s21 }
 0x6dd   :  { %1161 = vrot.lane.b32.xlu0 %v567_v36, %s2799_s23 }
 0x6e1   :  { %1683 = vrot.lane.b32.xlu0 %v2902_v39, %s2798_s22 }
 0x730   :  { %v656_v40 = vpop.xlane.xlu0 %655 }
 0x731   :  { %v657_v41 = vsub.f32 %v653_v37, %v656_v40 }
 0x733   :  { %v658_v42 = vmul.f32 1.442695, %v657_v41 }
 0x734   :  { %v666_v43 = vpop.permute.xlu0 %665 }
 0x735   :  { %2683 = vpow2.f32 %v658_v42  ;;  %2551 = vmatpush3.msra.mxu1 %v666_v43 }
 0x736   :  { %2555 = vmatprep.subr.mxu1 %v2796_v60 }
 0x738   :  { %v742_v46 = vpop.permute.xlu0 %741 }
 0x73c   :  { %v913_v48 = vpop.permute.xlu0 %912 }
 0x740   :  { %v1083_v51 = vpop.permute.xlu0 %1082 }
 0x742   :  { %v2684_v44 = vpop.eup %2683 }
 0x743   :  { %v660_v45 = vsel %vm577_vm2, %v2684_v44, 0.0 }
 0x744   :  { %661 = vadd.xlane.f32.xlu1 %v660_v45  ;;  %v1436_v53 = vpop.permute.xlu0 %1435 }
 0x748   :  { %v1607_v58 = vpop.permute.xlu0 %1606 }
 0x74c   :  { %v1777_v61 = vpop.permute.xlu0 %1776 }
 0x750   :  { %v822_v14 = vpop.permute.xlu0 %821 }
 0x754   :  { %v1162_v27 = vpop.permute.xlu0 %1161 }
 0x755   :  { %914 = vrot.lane.b32.xlu1 %v2845_v7, %s2802_s26 }
 0x758   :  { %v1684_v42 = vpop.permute.xlu0 %1683 }
 0x759   :  { %1084 = vrot.lane.b32.xlu1 %v2845_v7, %s2803_s27 }
 0x75d   :  { %1268 = vrot.lane.b32.xlu1 %v2849_v8, %s2795_s21 }
 0x761   :  { %1433 = vrot.lane.b32.xlu1 %v2849_v8, %s2799_s23 }
 0x765   :  { %1604 = vrot.lane.b32.xlu1 %v2849_v8, %s2800_s24 }
 0x769   :  { %1774 = vrot.lane.b32.xlu1 %v2849_v8, %s2801_s25 }
 0x76d   :  { %991 = vrot.lane.b32.xlu1 %v567_v36, %s2798_s22 }
 0x771   :  { %1513 = vrot.lane.b32.xlu1 %v2902_v39, %s2795_s21 }
 0x775   :  { %1853 = vrot.lane.b32.xlu1 %v2902_v39, %s2799_s23 }
 0x7cd   :  { %v662_v49 = vpop.xlane.xlu1 %661 }
 0x7ce   :  { %2685 = vrcp.f32 %v662_v49 }
 0x7d1   :  { %v915_v50 = vpop.permute.xlu1 %914 }
 0x7d2   :  { %2566 = vmatpush3.xpose.msk.msra.mxu0 %vm577_vm2, %v915_v50 }
 0x7d3   :  { %2575 = vmatprep.subr.mxu0 %v2796_v60 }
 0x7d5   :  { %v1085_v52 = vpop.permute.xlu1 %1084  ;;  %2568 = vmatmul.mubr.msk.f32.vlgmr.msra.gmra.mxu0 %vm577_vm2, %v913_v48 }
 0x7d6   :  { %2576 = vmatpush3.xpose.msk.msra.mxu0 %vm577_vm2, %v1085_v52  ;;  %2577 = vmatprep.mubr.msk.f32.mxu0 %vm2797_vm3, %v2796_v60 }
 0x7d7   :  { %2585 = vmatprep.subr.mxu0 %v2796_v60 }
 0x7d9   :  { %v1269_v54 = vpop.permute.xlu1 %1268  ;;  %2578 = vmatmul.mubr.msk.f32.vlgmr.msra.gmra.mxu0 %vm577_vm2, %v1083_v51 }
 0x7da   :  { %2586 = vmatpush3.xpose.msk.msra.mxu0 %vm577_vm2, %v1269_v54  ;;  %2587 = vmatprep.mubr.msk.f32.mxu0 %vm2797_vm3, %v2796_v60 }
 0x7db   :  { %v2686_v55 = vpop.eup %2685  ;;  %2595 = vmatprep.subr.mxu0 %v2796_v60 }
 0x7dc   :  { %v664_v56 = vmul.f32 %v2686_v55, %v2684_v44 }
 0x7dd   :  { %v1434_v57 = vpop.permute.xlu1 %1433  ;;  %2588 = vmatmul.mubr.msk.f32.vlgmr.msra.gmra.mxu0 %vm577_vm2, %v2849_v8 }
 0x7de   :  { %2553 = vmatmul.mubr.msk.f32.vlgmr.msra.gmra.mxu1 %vm577_vm2, %v664_v56  ;;  %2596 = vmatpush3.xpose.msk.msra.mxu0 %vm577_vm2, %v1436_v53 }
 0x7df   :  { %2556 = vmatpush3.xpose.msk.msra.mxu1 %vm577_vm2, %v744_v47  ;;  %2597 = vmatprep.mubr.msk.f32.mxu0 %vm2797_vm3, %v2796_v60 }
 0x7e0   :  { %2557 = vmatprep.mubr.msk.f32.mxu1 %vm2797_vm3, %v2796_v60  ;;  %2605 = vmatprep.subr.mxu0 %v2796_v60 }
 0x7e1   :  { %2598 = vmatmul.mubr.msk.f32.vlgmr.msra.gmra.mxu0 %vm577_vm2, %v1434_v57  ;;  %2560 = vmatprep.subr.mxu1 %v2796_v60  ;;  %v1605_v59 = vpop.permute.xlu1 %1604 }
 0x7e2   :  { %2558 = vmatmul.mubr.msk.f32.vlgmr.msra.gmra.mxu1 %vm577_vm2, %v742_v46  ;;  %2606 = vmatpush3.xpose.msk.msra.mxu0 %vm577_vm2, %v1607_v58 }
 0x7e3   :  { %2607 = vmatprep.mubr.msk.f32.mxu0 %vm2797_vm3, %v2796_v60  ;;  %2615 = vmatprep.subr.mxu0 %v2796_v60 }
 0x7e4   :  { %2562 = vmatprep.mubr.msk.f32.mxu1 %vm2797_vm3, %v2796_v60 }
 0x7e5   :  { %2608 = vmatmul.mubr.msk.f32.vlgmr.msra.gmra.mxu0 %vm577_vm2, %v1605_v59  ;;  %v1775_v62 = vpop.permute.xlu1 %1774 }
 0x7e6   :  { %2616 = vmatpush3.xpose.msk.msra.mxu0 %vm577_vm2, %v1777_v61  ;;  %2617 = vmatprep.mubr.msk.f32.mxu0 %vm2797_vm3, %v2796_v60 }
 0x7e9   :  { %2618 = vmatmul.mubr.msk.f32.vlgmr.msra.gmra.mxu0 %vm577_vm2, %v1775_v62  ;;  %v992_v1 = vpop.permute.xlu1 %991 }
 0x7ed   :  { %v1514_v19 = vpop.permute.xlu1 %1513 }
 0x7f1   :  { %v1854_v35 = vpop.permute.xlu1 %1853 }
 0x895   :  { %v986_v63 = vpop.f32.mrf.mxu0 }
 0x896   :  { %v990_v0 = vmul.f32 0.35355338, %v986_v63 }
 0x897   :  { %v2569_v4 = vpop.f32.mrf.mxu0 }
 0x898   :  { %v994_v5 = vadd.f32 %v992_v1, %v990_v0 }
 0x899   :  { %v1156_v6 = vpop.f32.mrf.mxu0 }
 0x89a   :  { %v995_v9 = vsel %vm577_vm2, %v994_v5, -inf  ;;  %v1160_v20 = vmul.f32 0.35355338, %v1156_v6 }
 0x89b   :  { %996 = vmax.xlane.f32.xlu1 %v995_v9  ;;  %v2579_v10 = vpop.f32.mrf.mxu0 }
 0x89c   :  { %v1164_v32 = vadd.f32 %v1162_v27, %v1160_v20 }
 0x89d   :  { %v1340_v11 = vpop.f32.mrf.mxu0 }
 0x89e   :  { %v2958_v12 = vpop.f32.mrf.mxu1  ;;  %v1344_v29 = vmul.f32 0.35355338, %v1340_v11  ;;  %v1165_v38 = vsel %vm577_vm2, %v1164_v32, -inf }
 0x89f   :  { %v2589_v13 = vpop.f32.mrf.mxu0 }
 0x8a0   :  { %v2554_v15 = vpop.f32.mrf.mxu1  ;;  %v1345_v40 = vadd.f32 %v1344_v29, %v2902_v39 }
 0x8a1   :  { %v1507_v16 = vpop.f32.mrf.mxu0 }
 0x8a2   :  { %v1511_v17 = vmul.f32 0.35355338, %v1507_v16  ;;  %v815_v18 = vpop.f32.mrf.mxu1  ;;  %v1346_v44 = vsel %vm577_vm2, %v1345_v40, -inf }
 0x8a3   :  { %v819_v21 = vmul.f32 0.35355338, %v815_v18  ;;  %v2599_v22 = vpop.f32.mrf.mxu0 }
 0x8a4   :  { %v2559_v23 = vpop.f32.mrf.mxu1  ;;  %v1516_v24 = vadd.f32 %v1514_v19, %v1511_v17 }
 0x8a5   :  { %v1678_v25 = vpop.f32.mrf.mxu0  ;;  %v824_v26 = vadd.f32 %v822_v14, %v819_v21 }
 0x8a6   :  { %v1517_v28 = vsel %vm577_vm2, %v1516_v24, -inf  ;;  %v1682_v36 = vmul.f32 0.35355338, %v1678_v25 }
 0x8a7   :  { %1518 = vmax.xlane.f32.xlu1 %v1517_v28  ;;  %v2609_v30 = vpop.f32.mrf.mxu0  ;;  %v825_v31 = vsel %vm577_vm2, %v824_v26, -inf }
 0x8a8   :  { %826 = vmax.xlane.f32.xlu0 %v825_v31  ;;  %v1686_v45 = vadd.f32 %v1684_v42, %v1682_v36 }
 0x8a9   :  { %v1848_v33 = vpop.f32.mrf.mxu0 }
 0x8aa   :  { %v1852_v34 = vmul.f32 0.35355338, %v1848_v33  ;;  %v1687_v46 = vsel %vm577_vm2, %v1686_v45, -inf }
 0x8ab   :  { %v2619_v37 = vpop.f32.mrf.mxu0 }
 0x8ac   :  { %1166 = vmax.xlane.f32.xlu0 %v1165_v38  ;;  %v1856_v41 = vadd.f32 %v1854_v35, %v1852_v34 }
 0x8ae   :  { %v1857_v43 = vsel %vm577_vm2, %v1856_v41, -inf }
 0x8af   :  { %1858 = vmax.xlane.f32.xlu1 %v1857_v43 }
 0x8b0   :  { %1347 = vmax.xlane.f32.xlu0 %v1346_v44 }
 0x8b4   :  { %1688 = vmax.xlane.f32.xlu0 %v1687_v46 }
 0x924   :  { %v997_v47 = vpop.xlane.xlu1 %996 }
 0x925   :  { %v998_v48 = vsub.f32 %v994_v5, %v997_v47 }
 0x927   :  { %v999_v49 = vmul.f32 1.442695, %v998_v48 }
 0x929   :  { %2687 = vpow2.f32 %v999_v49 }
 0x930   :  { %v1519_v50 = vpop.xlane.xlu1 %1518 }
 0x931   :  { %v827_v51 = vpop.xlane.xlu0 %826  ;;  %v1520_v39 = vsub.f32 %v1516_v24, %v1519_v50 }
 0x932   :  { %v828_v63 = vsub.f32 %v824_v26, %v827_v51 }
 0x933   :  { %v1521_v56 = vmul.f32 1.442695, %v1520_v39 }
 0x934   :  { %v829_v6 = vmul.f32 1.442695, %v828_v63 }
 0x935   :  { %v1167_v52 = vpop.xlane.xlu0 %1166 }
 0x936   :  { %v2967_v53 = vpop.eup %2687  ;;  %v1168_v54 = vsub.f32 %v1164_v32, %v1167_v52  ;;  %v1962_v52 = vld [vmem:[#allocation5 + $0xf0] sm:$0xff] }
 0x937   :  { %v1001_v55 = vsel %vm577_vm2, %v2967_v53, 0.0  ;;  %2625 = vmatprep.subr.mxu0 %v1962_v52 }
 0x938   :  { %v1169_v57 = vmul.f32 1.442695, %v1168_v54  ;;  %1002 = vadd.xlane.f32.xlu1 %v1001_v55  ;;  %v1859_v58 = vpop.xlane.xlu1 %1858  ;;  %2626 = vmatpush3.msra.mxu0 %v1962_v52  ;;  %v2185_v52 = vld [vmem:[#allocation5 + $0x140] sm:$0xff] }
 0x939   :  { %v1860_v59 = vsub.f32 %v1856_v41, %v1859_v58  ;;  %v1348_v61 = vpop.xlane.xlu0 %1347 }
 0x93a   :  { %2689 = vpow2.f32 %v1169_v57  ;;  %v1349_v62 = vsub.f32 %v1345_v40, %v1348_v61 }
 0x93b   :  { %2691 = vpow2.f32 %v1521_v56  ;;  %v1861_v0 = vmul.f32 1.442695, %v1860_v59  ;;  %v1959_v56 = vld [vmem:[#allocation5 + $0xd8] sm:$0xff] }
 0x93c   :  { %v1350_v1 = vmul.f32 1.442695, %v1349_v62 }
 0x93d   :  { %v1689_v4 = vpop.xlane.xlu0 %1688 }
 0x93e   :  { %2693 = vpow2.f32 %v1350_v1  ;;  %v1690_v5 = vsub.f32 %v1686_v45, %v1689_v4 }
 0x93f   :  { %2695 = vpow2.f32 %v1861_v0 }
 0x940   :  { %v1691_v9 = vmul.f32 1.442695, %v1690_v5 }
 0x942   :  { %2697 = vpow2.f32 %v1691_v9 }
 0x943   :  { %2699 = vpow2.f32 %v829_v6 }
 0x947   :  { %v2690_v10 = vpop.eup %2689 }
 0x948   :  { %v1171_v11 = vsel %vm577_vm2, %v2690_v10, 0.0  ;;  %v2972_v13 = vpop.eup %2691 }
 0x949   :  { %1172 = vadd.xlane.f32.xlu0 %v1171_v11  ;;  %v1523_v15 = vsel %vm577_vm2, %v2972_v13, 0.0 }
 0x94b   :  { %v2974_v14 = vpop.eup %2693 }
 0x94c   :  { %v1352_v16 = vsel %vm577_vm2, %v2974_v14, 0.0  ;;  %v2980_v17 = vpop.eup %2695 }
 0x94d   :  { %1524 = vadd.xlane.f32.xlu0 %v1523_v15  ;;  %1353 = vadd.xlane.f32.xlu1 %v1352_v16  ;;  %v1863_v19 = vsel %vm577_vm2, %v2980_v17, 0.0 }
 0x94f   :  { %v2982_v18 = vpop.eup %2697 }
 0x950   :  { %v1693_v20 = vsel %vm577_vm2, %v2982_v18, 0.0  ;;  %v2700_v21 = vpop.eup %2699 }
 0x951   :  { %1864 = vadd.xlane.f32.xlu0 %v1863_v19  ;;  %1694 = vadd.xlane.f32.xlu1 %v1693_v20  ;;  %v831_v22 = vsel %vm577_vm2, %v2700_v21, 0.0  ;;  %v2375_v20 = vld [vmem:[#allocation5 + $0xf8] ss:$0 sm:$0xff] }
 0x955   :  { %832 = vadd.xlane.f32.xlu0 %v831_v22 }
 0x962   :  { %836 = vrot.lane.b32.xlu1 %v2845_v7, %s2804_s28 }
 0x966   :  { %1176 = vrot.lane.b32.xlu1 %v2845_v7, %s2805_s29 }
 0x96a   :  { %1357 = vrot.lane.b32.xlu1 %v2849_v8, %s2798_s22 }
 0x96b   :  { %1006 = vrot.lane.b32.xlu0 %v2845_v7, %s2806_s30 }
 0x96e   :  { %1698 = vrot.lane.b32.xlu1 %v2849_v8, %s2806_s30 }
 0x96f   :  { %1528 = vrot.lane.b32.xlu0 %v2849_v8, %s2804_s28 }
 0x973   :  { %1868 = vrot.lane.b32.xlu0 %v2849_v8, %s2805_s29 }
 0x9c1   :  { %v1003_v23 = vpop.xlane.xlu1 %1002 }
 0x9d2   :  { %v1173_v24 = vpop.xlane.xlu0 %1172 }
 0x9d6   :  { %v1354_v25 = vpop.xlane.xlu1 %1353  ;;  %v1525_v26 = vpop.xlane.xlu0 %1524 }
 0x9da   :  { %v1695_v27 = vpop.xlane.xlu1 %1694  ;;  %v1865_v28 = vpop.xlane.xlu0 %1864 }
 0x9de   :  { %v837_v29 = vpop.permute.xlu1 %836  ;;  %v833_v30 = vpop.xlane.xlu0 %832 }
 0x9df   :  { %2701 = vrcp.f32 %v833_v30  ;;  %2561 = vmatpush3.msra.mxu1 %v837_v29 }
 0x9e0   :  { %2570 = vmatprep.subr.mxu1 %v2796_v60  ;;  %2703 = vrcp.f32 %v1003_v23 }
 0x9e1   :  { %2705 = vrcp.f32 %v1173_v24 }
 0x9e2   :  { %2707 = vrcp.f32 %v1354_v25  ;;  %v1007_v8 = vpop.permute.xlu0 %1006  ;;  %v1177_v33 = vpop.permute.xlu1 %1176 }
 0x9e3   :  { %2709 = vrcp.f32 %v1525_v26 }
 0x9e4   :  { %2711 = vrcp.f32 %v1695_v27 }
 0x9e5   :  { %2713 = vrcp.f32 %v1865_v28 }
 0x9e6   :  { %v1358_v38 = vpop.permute.xlu1 %1357  ;;  %v1529_v42 = vpop.permute.xlu0 %1528 }
 0x9ea   :  { %v1699_v45 = vpop.permute.xlu1 %1698  ;;  %v1869_v48 = vpop.permute.xlu0 %1868 }
 0x9ec   :  { %v2702_v7 = vpop.eup %2701 }
 0x9ed   :  { %v835_v31 = vmul.f32 %v2702_v7, %v2700_v21  ;;  %v2704_v32 = vpop.eup %2703 }
 0x9ee   :  { %v1005_v34 = vmul.f32 %v2704_v32, %v2967_v53  ;;  %v2706_v35 = vpop.eup %2705  ;;  %v1961_v53 = vld [vmem:[#allocation5 + $0xe8] sm:$0xff] }
 0x9ef   :  { %2563 = vmatmul.mubr.msk.f32.vlgmr.msra.gmra.mxu1 %vm577_vm2, %v835_v31  ;;  %v1175_v36 = vmul.f32 %v2706_v35, %v2690_v10  ;;  %v2708_v37 = vpop.eup %2707  ;;  %2627 = vmatprep.subr.mxu0 %v1961_v53  ;;  %v2093_v35 = vld [vmem:[#allocation5 + $0x118] sm:$0xff] }
 0x9f0   :  { %2571 = vmatpush3.msra.mxu1 %v1007_v8  ;;  %2572 = vmatprep.mubr.msk.f32.mxu1 %vm2797_vm3, %v2796_v60  ;;  %v1356_v40 = vmul.f32 %v2708_v37, %v2974_v14  ;;  %v2710_v41 = vpop.eup %2709 }
 0x9f1   :  { %2580 = vmatprep.subr.mxu1 %v2796_v60  ;;  %v1527_v43 = vmul.f32 %v2710_v41, %v2972_v13  ;;  %v2712_v44 = vpop.eup %2711  ;;  %2628 = vmatpush3.msra.mxu0 %v1961_v53  ;;  %v2184_v53 = vld [vmem:[#allocation5 + $0x138] sm:$0xff] }
 0x9f2   :  { %v1697_v46 = vmul.f32 %v2712_v44, %v2982_v18  ;;  %v2714_v47 = vpop.eup %2713  ;;  %v2378_v44 = vld [vmem:[#allocation5 + $0x100] ss:$0 sm:$0xff] }
 0x9f3   :  { %2573 = vmatmul.mubr.msk.f32.vlgmr.msra.gmra.mxu1 %vm577_vm2, %v1005_v34  ;;  %v1867_v49 = vmul.f32 %v2714_v47, %v2980_v17 }
 0x9f4   :  { %2581 = vmatpush3.msra.mxu1 %v1177_v33  ;;  %2582 = vmatprep.mubr.msk.f32.mxu1 %vm2797_vm3, %v2796_v60 }
 0x9f5   :  { %2590 = vmatprep.subr.mxu1 %v2796_v60 }
 0x9f7   :  { %2583 = vmatmul.mubr.msk.f32.vlgmr.msra.gmra.mxu1 %vm577_vm2, %v1175_v36 }
 0x9f8   :  { %2591 = vmatpush3.msra.mxu1 %v1358_v38  ;;  %2592 = vmatprep.mubr.msk.f32.mxu1 %vm2797_vm3, %v2796_v60 }
 0x9f9   :  { %2600 = vmatprep.subr.mxu1 %v2796_v60 }
 0x9fb   :  { %2593 = vmatmul.mubr.msk.f32.vlgmr.msra.gmra.mxu1 %vm577_vm2, %v1356_v40 }
 0x9fc   :  { %2601 = vmatpush3.msra.mxu1 %v1529_v42  ;;  %2602 = vmatprep.mubr.msk.f32.mxu1 %vm2797_vm3, %v2796_v60 }
 0x9fd   :  { %2610 = vmatprep.subr.mxu1 %v2796_v60 }
 0x9ff   :  { %2603 = vmatmul.mubr.msk.f32.vlgmr.msra.gmra.mxu1 %vm577_vm2, %v1527_v43 }
 0xa00   :  { %2611 = vmatpush3.msra.mxu1 %v1699_v45  ;;  %2612 = vmatprep.mubr.msk.f32.mxu1 %vm2797_vm3, %v2796_v60 }
 0xa01   :  { %2620 = vmatprep.subr.mxu1 %v2796_v60 }
 0xa03   :  { %2613 = vmatmul.mubr.msk.f32.vlgmr.msra.gmra.mxu1 %vm577_vm2, %v1697_v46 }
 0xa04   :  { %2621 = vmatpush3.msra.mxu1 %v1869_v48  ;;  %2622 = vmatprep.mubr.msk.f32.mxu1 %vm2797_vm3, %v2796_v60  ;;  %v1960_v60 = vld [vmem:[#allocation5 + $0xe0] sm:$0xff] }
 0xa05   :  { %2629 = vmatprep.subr.mxu0 %v1960_v60  ;;  %2636 = vmatprep.subr.mxu1 %v2093_v35 }
 0xa06   :  { %2630 = vmatpush3.msra.mxu0 %v1960_v60  ;;  %v2380_v60 = vld [vmem:[#allocation5 + $0x120] ss:$0 sm:$0xff] }
 0xa07   :  { %2623 = vmatmul.mubr.msk.f32.vlgmr.msra.gmra.mxu1 %vm577_vm2, %v1867_v49  ;;  %2631 = vmatprep.subr.mxu0 %v1959_v56  ;;  %v2379_v49 = vld [vmem:[#allocation5 + $0x108] ss:$0 sm:$0xff] }
 0xa08   :  { %2632 = vmatpush3.msra.mxu0 %v1959_v56  ;;  %2637 = vmatpush3.msra.mxu1 %v2093_v35 }
 0xaaf   :  { %v908_v50 = vpop.f32.mrf.mxu1 }
 0xab0   :  { %1253 = vrot.lane.b32.xlu1 %v908_v50, %s2791_s13 }
 0xab1   :  { %v2564_v51 = vpop.f32.mrf.mxu1 }
 0xab3   :  { %v1078_v39 = vpop.f32.mrf.mxu1 }
 0xab4   :  { %1257 = vrot.lane.b32.xlu0 %v1078_v39, %s2807_s3 }
 0xab5   :  { %v2574_v54 = vpop.f32.mrf.mxu1 }
 0xab6   :  { %v2183_v54 = vld [vmem:[#allocation5 + $0x130] sm:$0xff] }
 0xab7   :  { %v1248_v55 = vpop.f32.mrf.mxu1 }
 0xab8   :  { %1261 = vrot.lane.b32.xlu0 %v1248_v55, %s2808_s4  ;;  %v2182_v55 = vld [vmem:[#allocation5 + $0x128] sm:$0xff] }
 0xab9   :  { %v2584_v57 = vpop.f32.mrf.mxu1 }
 0xabb   :  { %v1429_v58 = vpop.f32.mrf.mxu1 }
 0xabd   :  { %v2594_v59 = vpop.f32.mrf.mxu1 }
 0xabf   :  { %v1600_v61 = vpop.f32.mrf.mxu1 }
 0xac0   :  { %1945 = vrot.lane.b32.xlu1 %v1600_v61, %s2791_s13 }
 0xac1   :  { %v2604_v62 = vpop.f32.mrf.mxu1 }
 0xac3   :  { %v1770_v63 = vpop.f32.mrf.mxu1 }
 0xac4   :  { %1949 = vrot.lane.b32.xlu1 %v1770_v63, %s2807_s3  ;;  %v2383_v63 = vld [vmem:[#allocation5 + $0x148] ss:$0 sm:$0xff] }
 0xac5   :  { %v2614_v0 = vpop.f32.mrf.mxu1 }
 0xac7   :  { %v1940_v1 = vpop.f32.mrf.mxu1 }
 0xac8   :  { %1953 = vrot.lane.b32.xlu0 %v1940_v1, %s2808_s4 }
 0xac9   :  { %v2624_v4 = vpop.f32.mrf.mxu1 }
 0xb22   :  { %v1254_v5 = vpop.permute.xlu1 %1253 }
 0xb23   :  { %v1264_v9 = vsel %vm577_vm2, %v2958_v12, %v1254_v5 }
 0xb26   :  { %v1258_v6 = vpop.permute.xlu0 %1257 }
 0xb27   :  { %v1265_v10 = vsel %vm49_vm0, %v1264_v9, %v1258_v6 }
 0xb2a   :  { %v1262_v11 = vpop.permute.xlu0 %1261 }
 0xb2b   :  { %v1267_v13 = vsel %vm1266_vm4, %v1265_v10, %v1262_v11 }
 0xb2c   :  { %2633 = vmatprep.mubr.msk.f32.mxu0 %vm1968_vm5, %v1267_v13 }
 0xb32   :  { %v1946_v14 = vpop.permute.xlu1 %1945 }
 0xb33   :  { %v1956_v16 = vsel %vm577_vm2, %v1429_v58, %v1946_v14 }
 0xb36   :  { %v1950_v15 = vpop.permute.xlu1 %1949 }
 0xb37   :  { %v1957_v17 = vsel %vm49_vm0, %v1956_v16, %v1950_v15 }
 0xb3a   :  { %v1954_v18 = vpop.permute.xlu0 %1953 }
 0xb3b   :  { %v1958_v19 = vsel %vm1266_vm4, %v1957_v17, %v1954_v18 }
 0xb3c   :  { %2634 = vmatmul.mubr.msk.f32.vlgmr.msra.gmra.mxu0 %vm1968_vm5, %v1958_v19 }
 0xbfc   :  { %v2635_v21 = vpop.f32.mrf.mxu0 }
 0xbfd   :  { %v2047_v12 = vadd.f32 %v2635_v21, %v2375_v20 }
 0xbfe   :  { %v2041_v22 = vpop.f32.mrf.mxu0 }
 0xbff   :  { %v2042_v23 = vadd.f32 %v2375_v20, %v2041_v22  ;;  %v2051_v24 = vadd.f32 %v2047_v12, %v2841_v3 }
 0xc01   :  { %v2057_v25 = vsel %vm49_vm0, %v2051_v24, 0.0  ;;  %v2050_v26 = vadd.f32 %v2042_v23, %v2837_v2  ;;  %v2092_v2 = vld [vmem:[#allocation5 + $0x110] sm:$0xff] }
 0xc02   :  { %2058 = vadd.xlane.f32.xlu0 %v2057_v25  ;;  %2638 = vmatprep.subr.mxu1 %v2092_v2 }
 0xc03   :  { %v2054_v27 = vsel %vm49_vm0, %v2050_v26, 0.0  ;;  %2639 = vmatpush3.msra.mxu1 %v2092_v2 }
 0xc04   :  { %2055 = vadd.xlane.f32.xlu1 %v2054_v27  ;;  %2643 = vmatprep.subr.mxu1 %v2185_v52 }
 0xc8b   :  { %v2059_v28 = vpop.xlane.xlu0 %2058 }
 0xc8c   :  { %v2061_v29 = vmul.f32 0.0625, %v2059_v28 }
 0xc8d   :  { %v2056_v30 = vpop.xlane.xlu1 %2055 }
 0xc8e   :  { %v2063_v7 = vsub.f32 %v2051_v24, %v2061_v29  ;;  %v2060_v31 = vmul.f32 0.0625, %v2056_v30  ;;  %v2386_v29 = vld [vmem:[#allocation5 + $0x150] ss:$0 sm:$0xff] }
 0xc90   :  { %v2062_v32 = vsub.f32 %v2050_v26, %v2060_v31  ;;  %v2065_v8 = vmul.f32 %v2063_v7, %v2063_v7  ;;  %v2387_v31 = vld [vmem:[#allocation5 + $0x158] ss:$0 sm:$0xff] }
 0xc92   :  { %v2069_v33 = vsel %vm49_vm0, %v2065_v8, 0.0  ;;  %v2064_v34 = vmul.f32 %v2062_v32, %v2062_v32 }
 0xc93   :  { %2070 = vadd.xlane.f32.xlu1 %v2069_v33 }
 0xc94   :  { %v2066_v3 = vsel %vm49_vm0, %v2064_v34, 0.0 }
 0xc95   :  { %2067 = vadd.xlane.f32.xlu0 %v2066_v3 }
 0xd1c   :  { %v2071_v36 = vpop.xlane.xlu1 %2070 }
 0xd1d   :  { %v2073_v37 = vmul.f32 0.0625, %v2071_v36 }
 0xd1e   :  { %v2068_v38 = vpop.xlane.xlu0 %2067 }
 0xd1f   :  { %v2075_v40 = vadd.f32 1e-05, %v2073_v37  ;;  %v2072_v41 = vmul.f32 0.0625, %v2068_v38 }
 0xd21   :  { %2715 = vrsqrt.f32 %v2075_v40  ;;  %v2074_v42 = vadd.f32 1e-05, %v2072_v41 }
 0xd23   :  { %2717 = vrsqrt.f32 %v2074_v42 }
 0xd2e   :  { %v2716_v43 = vpop.eup %2715 }
 0xd2f   :  { %v2079_v45 = vmul.f32 %v2716_v43, %v2063_v7 }
 0xd30   :  { %v2718_v46 = vpop.eup %2717 }
 0xd31   :  { %v2078_v47 = vmul.f32 %v2718_v46, %v2062_v32  ;;  %v2085_v48 = vmul.f32 %v2378_v44, %v2079_v45 }
 0xd33   :  { %v2084_v50 = vmul.f32 %v2378_v44, %v2078_v47  ;;  %v2091_v39 = vadd.f32 %v2379_v49, %v2085_v48 }
 0xd35   :  { %v2090_v51 = vadd.f32 %v2379_v49, %v2084_v50 }
 0xd37   :  { %2640 = vmatprep.mubr.msk.f32.mxu1 %vm49_vm0, %v2090_v51 }
 0xd38   :  { %2641 = vmatmul.mubr.msk.f32.vlgmr.msra.gmra.mxu1 %vm49_vm0, %v2091_v39 }
 0xd39   :  { %2644 = vmatpush3.msra.mxu1 %v2185_v52 }
 0xd3a   :  { %2645 = vmatprep.subr.mxu1 %v2184_v53 }
 0xd3b   :  { %2646 = vmatpush3.msra.mxu1 %v2184_v53 }
 0xd3c   :  { %2647 = vmatprep.subr.mxu1 %v2183_v54 }
 0xd3d   :  { %2648 = vmatpush3.msra.mxu1 %v2183_v54 }
 0xd3e   :  { %2649 = vmatprep.subr.mxu1 %v2182_v55 }
 0xd3f   :  { %2650 = vmatpush3.msra.mxu1 %v2182_v55 }
 0xdf8   :  { %v2642_v56 = vpop.f32.mrf.mxu1 }
 0xdf9   :  { %v2177_v57 = vadd.f32 %v2642_v56, %v2380_v60 }
 0xdfa   :  { %v2171_v58 = vpop.f32.mrf.mxu1 }
 0xdfb   :  { %v2172_v59 = vadd.f32 %v2380_v60, %v2171_v58  ;;  %v2181_v62 = vmax.f32 %v2177_v57, 0.0 }
 0xdfd   :  { %v2180_v61 = vmax.f32 %v2172_v59, 0.0 }
 0xdff   :  { %2651 = vmatprep.mubr.msk.f32.mxu1 %vm1968_vm5, %v2180_v61 }
 0xe00   :  { %2652 = vmatmul.mubr.msk.f32.vlgmr.msra.gmra.mxu1 %vm1968_vm5, %v2181_v62 }
 0xec0   :  { %v2653_v0 = vpop.f32.mrf.mxu1 }
 0xec1   :  { %v2269_v1 = vadd.f32 %v2653_v0, %v2383_v63 }
 0xec2   :  { %v2263_v4 = vpop.f32.mrf.mxu1 }
 0xec3   :  { %v2264_v5 = vadd.f32 %v2383_v63, %v2263_v4  ;;  %v2273_v6 = vadd.f32 %v2269_v1, %v2091_v39 }
 0xec5   :  { %v2279_v9 = vsel %vm49_vm0, %v2273_v6, 0.0  ;;  %v2272_v10 = vadd.f32 %v2264_v5, %v2090_v51 }
 0xec6   :  { %2280 = vadd.xlane.f32.xlu1 %v2279_v9 }
 0xec7   :  { %v2276_v11 = vsel %vm49_vm0, %v2272_v10, 0.0 }
 0xec8   :  { %2277 = vadd.xlane.f32.xlu0 %v2276_v11 }
 0xf4f   :  { %v2281_v13 = vpop.xlane.xlu1 %2280 }
 0xf50   :  { %v2283_v14 = vmul.f32 0.0625, %v2281_v13 }
 0xf51   :  { %v2278_v15 = vpop.xlane.xlu0 %2277 }
 0xf52   :  { %v2285_v16 = vsub.f32 %v2273_v6, %v2283_v14  ;;  %v2282_v17 = vmul.f32 0.0625, %v2278_v15 }
 0xf54   :  { %v2284_v18 = vsub.f32 %v2272_v10, %v2282_v17  ;;  %v2287_v19 = vmul.f32 %v2285_v16, %v2285_v16 }
 0xf56   :  { %v2291_v20 = vsel %vm49_vm0, %v2287_v19, 0.0  ;;  %v2286_v21 = vmul.f32 %v2284_v18, %v2284_v18 }
 0xf57   :  { %2292 = vadd.xlane.f32.xlu1 %v2291_v20 }
 0xf58   :  { %v2288_v12 = vsel %vm49_vm0, %v2286_v21, 0.0 }
 0xf59   :  { %2289 = vadd.xlane.f32.xlu0 %v2288_v12 }
 0xfe0   :  { %v2293_v22 = vpop.xlane.xlu1 %2292 }
 0xfe1   :  { %v2295_v23 = vmul.f32 0.0625, %v2293_v22 }
 0xfe2   :  { %v2290_v24 = vpop.xlane.xlu0 %2289 }
 0xfe3   :  { %v2297_v25 = vadd.f32 1e-05, %v2295_v23  ;;  %v2294_v26 = vmul.f32 0.0625, %v2290_v24 }
 0xfe5   :  { %2719 = vrsqrt.f32 %v2297_v25  ;;  %v2296_v27 = vadd.f32 1e-05, %v2294_v26 }
 0xfe7   :  { %2721 = vrsqrt.f32 %v2296_v27 }
 0xff2   :  { %v2720_v28 = vpop.eup %2719 }
 0xff3   :  { %v2301_v30 = vmul.f32 %v2720_v28, %v2285_v16 }
 0xff4   :  { %v2722_v7 = vpop.eup %2721 }
 0xff5   :  { %v2300_v32 = vmul.f32 %v2722_v7, %v2284_v18  ;;  %v2307_v8 = vmul.f32 %v2386_v29, %v2301_v30 }
 0xff7   :  { %v2306_v33 = vmul.f32 %v2386_v29, %v2300_v32  ;;  %v2313_v34 = vadd.f32 %v2387_v31, %v2307_v8 }
 0xff9   :  { %v2312_v3 = vadd.f32 %v2387_v31, %v2306_v33  ;;  %2315 = vst.msk [vmem:[#allocation7 + $0x8] sm:$0xff] %vm49_vm0, %v2313_v34 }
 0xffb   :  { %2314 = vst.msk [vmem:[#allocation7] sm:$0xff] %vm49_vm0, %v2312_v3 }
 0xffc   :  { %2774 = shalt.err (!%p2771_p0)
}
 0xffd   :  { %2327 = dma.vmem_to_hbm [thread:$0]  %s2322_s6, 256, %s3060_s2, [#allocation4], %s2790_s12, %s2790_s12, %s2791_s13  }
 0xffe   :  { %2787 = dma.done.wait [#allocation4], 256  }
 0xfff   :  { %2788 = vsyncadd [#allocation4], 4294967040 }
0x1000   :  { %2331 = vsyncpa [#allocation3], 1 }
0x1001   :  { %2332 = vsyncpa [#allocation6], 1 }
0x1002   :  { %2333 = vsyncpa [#allocation4], 1 }

</bundles_post_ra>
